<compile_context>
chip_gen: v6e
topology: v6e:2x2x1
jax: 0.10.0
libtpu: 0.0.40
codegen_flags: <defaults>
</compile_context>

<pallas_src>
import functools
import math

import jax
import jax.numpy as jnp
from jax.experimental import pallas as pl
from jax.experimental.pallas import tpu as pltpu


PARAM_ORDER = ("ln1g", "ln1b", "wqkv", "bqkv", "wo", "bo",
               "ln2g", "ln2b", "w1", "b1", "w2", "b2")


def _layernorm(h, g, b, eps=1e-5):
    mu = jnp.mean(h, axis=-1, keepdims=True)
    var = jnp.mean((h - mu) ** 2, axis=-1, keepdims=True)
    return (h - mu) * jax.lax.rsqrt(var + eps) * g + b


# --------------------------------- kernel ------------------------------------

def _fft_coder_kernel(sched_ref, x_ref,
                      ln1g, ln1b, wqkv, bqkv, wo, bo,
                      ln2g, ln2b, w1, b1, w2, b2,
                      *refs,
                      n_heads, dk, dv, k_size, norm_first,
                      want_attn, want_bout, mm_dtype, attn_exact):
    out_ref = refs[0]
    pos = 1
    attn_ref = bout_ref = None
    if want_attn:
        attn_ref = refs[pos]
        pos += 1
    if want_bout:
        bout_ref = refs[pos]
        pos += 1
    x_sc = refs[pos]                                    # [Bb*S, D] f32 carry

    Bb, S, D = x_ref.shape
    T = Bb * S
    li = pl.program_id(1)                               # block index (arbitrary axis)
    n_li = pl.num_programs(1)

    # Load the batch tile once per batch step; keep it resident across blocks.
    @pl.when(li == 0)
    def _():
        x_sc[...] = x_ref[...].reshape(T, D).astype(jnp.float32)

    x = x_sc[...]                                       # [T, D] f32, token-major

    def mm(a, w):
        return jnp.dot(a, w, preferred_element_type=jnp.float32)

    # ---------------- multi-head self-attention sub-layer ----------------
    h = _layernorm(x, ln1g[0], ln1b[0]) if norm_first else x
    h_mm = h.astype(mm_dtype)                           # cast hoisted (single pack)

    nq = n_heads * dk
    qkv = mm(h_mm, wqkv[0]) + bqkv[0]                   # ONE fused QKV matmul
    q_all = qkv[:, :nq].astype(mm_dtype)
    k_all = qkv[:, nq:2 * nq].astype(mm_dtype)
    v_all = qkv[:, 2 * nq:].astype(mm_dtype)

    scale = 1.0 / math.sqrt(dk)
    attn_flag = sched_ref[0, li] if want_attn else None

    ctx_heads = []
    for hh in range(n_heads):
        q = q_all[:, hh * dk:(hh + 1) * dk].reshape(Bb, S, dk)
        k = k_all[:, hh * dk:(hh + 1) * dk].reshape(Bb, S, dk)
        v = v_all[:, hh * dv:(hh + 1) * dv].reshape(Bb, S, dv)
        s = jnp.einsum("bqd,bkd->bqk", q, k,
                       preferred_element_type=jnp.float32) * scale
        s = s - jnp.max(s, axis=-1, keepdims=True)
        e = jnp.exp(s)
        p = e * pl.reciprocal(jnp.sum(e, axis=-1, keepdims=True),
                              approx=not attn_exact)
        if attn_ref is not None:
            @pl.when(attn_flag == 1)                    # write only if block needed
            def _(p=p, hh=hh):
                attn_ref[0, hh] = p.astype(attn_ref.dtype)
        ctx = jnp.einsum("bqk,bkd->bqd", p.astype(mm_dtype), v,
                         preferred_element_type=jnp.float32)
        ctx_heads.append(ctx.reshape(T, dv))
    ctx_all = ctx_heads[0] if n_heads == 1 else jnp.concatenate(ctx_heads, axis=-1)
    x = x + mm(ctx_all.astype(mm_dtype), wo[0]) + bo[0]  # ONE fused output proj
    if not norm_first:
        x = _layernorm(x, ln1g[0], ln1b[0])

    # ---------------- position-wise Conv1d FFN sub-layer ----------------
    h2 = _layernorm(x, ln2g[0], ln2b[0]) if norm_first else x
    h2_mm = h2.astype(mm_dtype)
    pad = (k_size - 1) // 2
    Dh = w1.shape[-1]

    # Hoisted: one iota + one compare chain per distinct tap offset, shared by
    # both convs and all taps (JAX does not CSE broadcast_in_dim).
    s_idx = jax.lax.broadcasted_iota(jnp.int32, (T, 1), 0) % S
    offs = [t - pad for t in range(k_size)]
    masks = {off: jnp.logical_and(s_idx + off >= 0, s_idx + off < S)
             for off in set(offs) if off != 0}

    def shift(u, off):
        # out[b*S+s] = u[b*S+s+off] if 0 <= s+off < S else 0 (exact across batch)
        if off == 0:
            return u
        rolled = pltpu.roll(u, (-off) % T, 0)
        return jnp.where(masks[off], rolled, 0)

    # Conv 1: shift the NARROW [T, D] input (not the [T, Dh] output).
    acc1 = jnp.zeros((T, Dh), jnp.float32)
    for t in range(k_size):
        acc1 = acc1 + mm(shift(h2_mm, offs[t]), w1[0, t])
    y1_mm = jnp.maximum(acc1 + b1[0], 0.0).astype(mm_dtype)

    # Conv 2: shift the NARROW [T, D] output (input here is [T, Dh]).
    acc2 = jnp.zeros((T, D), jnp.float32)
    for t in range(k_size):
        acc2 = acc2 + shift(mm(y1_mm, w2[0, t]), offs[t])
    x = x + acc2 + b2[0]
    if not norm_first:
        x = _layernorm(x, ln2g[0], ln2b[0])

    # ---------------- carry / gated writebacks ----------------
    @pl.when(li < n_li - 1)
    def _():
        x_sc[...] = x

    @pl.when(li == n_li - 1)                 # final result stored only once
    def _():
        out_ref[...] = x.reshape(Bb, S, D).astype(out_ref.dtype)

    if bout_ref is not None:
        @pl.when(sched_ref[2, li] == 1)      # write only needed blocks
        def _():
            bout_ref[0] = x.reshape(Bb, S, D).astype(bout_ref.dtype)


# ------------------------------ wrapper helpers -------------------------------

def _compact_schedule(need, n_blocks):
    """flags[li]=1 if block li needed; slots[li]=compacted slot of the NEXT
    needed block >= li (clamped), so output writebacks always carry valid data."""
    need = sorted(set(int(i) for i in need if 0 <= int(i) < n_blocks))
    flags = [1 if i in need else 0 for i in range(n_blocks)]
    slots = [0] * n_blocks
    if need:
        j = len(need) - 1
        for li in range(n_blocks - 1, -1, -1):
            if flags[li]:
                j = need.index(li)
            slots[li] = j
    return need, flags, slots


def _fuse_block_params(p, w_dtype):
    """Fuse per-head Q/K/V weights into one wide matrix; flatten wo."""
    H, D, dk = p["wq"].shape
    dv = p["wv"].shape[-1]

    def heads_to_lanes(a, n):                # (H, D, n) -> (D, H*n), head-major
        return jnp.transpose(a, (1, 0, 2)).reshape(a.shape[1], H * n)

    wq = heads_to_lanes(p["wq"], dk)
    wk = heads_to_lanes(p["wk"], dk)
    wv = heads_to_lanes(p["wv"], dv)
    bq = jnp.transpose(p["bq"], (1, 0, 2)).reshape(1, H * dk)
    bk = jnp.transpose(p["bk"], (1, 0, 2)).reshape(1, H * dk)
    bv = jnp.transpose(p["bv"], (1, 0, 2)).reshape(1, H * dv)
    return {
        "ln1g": p["ln1g"], "ln1b": p["ln1b"],
        "wqkv": jnp.concatenate([wq, wk, wv], axis=-1).astype(w_dtype),
        "bqkv": jnp.concatenate([bq, bk, bv], axis=-1),
        "wo": p["wo"].reshape(H * dv, D).astype(w_dtype),
        "bo": p["bo"],
        "ln2g": p["ln2g"], "ln2b": p["ln2b"],
        "w1": p["w1"].astype(w_dtype), "b1": p["b1"],
        "w2": p["w2"].astype(w_dtype), "b2": p["b2"],
    }


def _tpu_vmem_budget():
    """(usable VMEM bytes, #TensorCores/chip heuristic) — generation aware."""
    vmem = 128 * 2 ** 20
    try:
        info = pltpu.get_tpu_info()
        vmem = int(getattr(info, "vmem_capacity_bytes", vmem) or vmem)
    except Exception:
        pass
    n_tc = 2 if vmem <= 64 * 2 ** 20 else 1      # v7x: 64 MiB/TC, 2 TCs per chip
    return int(0.78 * vmem), n_tc


# --------------------------------- wrapper ------------------------------------

def fft_coder(x, block_params_list, *, n_heads, dk, dv, k_size, norm_first=True,
              need_attn=(), need_block_out=(), batch_block=None,
              use_bf16_matmul=True, attn_dtype=None, interpret=False):
    """Fused FFTCoder.forward (defaults: no masks / no cross-attn / no dropout).

    Returns (X, attn_dict, block_out_dict), matching the PyTorch module.
    """
    B, S, D = x.shape
    L = len(block_params_list)
    mm_dtype = jnp.bfloat16 if use_bf16_matmul else jnp.float32
    attn_dtype = x.dtype if attn_dtype is None else attn_dtype

    attn_keys, attn_flags, attn_slots = _compact_schedule(need_attn, L)
    bout_keys, bout_flags, bout_slots = _compact_schedule(need_block_out, L)
    want_attn = len(attn_keys) > 0
    want_bout = len(bout_keys) > 0
    sched = jnp.array([attn_flags, attn_slots, bout_flags, bout_slots], jnp.int32)

    fused = [_fuse_block_params(p, mm_dtype) for p in block_params_list]
    stacked = {name: jnp.stack([p[name] for p in fused]) for name in PARAM_ORDER}
    Dh = block_params_list[0]["w1"].shape[-1]
    n_qkv = stacked["wqkv"].shape[-1]

    # ---- generation-aware batch tile & VMEM budget ----
    budget, n_tc = _tpu_vmem_budget()
    param_bytes = sum(
        math.prod(stacked[n].shape[1:]) * jnp.dtype(stacked[n].dtype).itemsize
        for n in PARAM_ORDER)
    xsz = jnp.dtype(x.dtype).itemsize

    def est(bb):
        T = bb * S
        e = 4 * T * D * xsz                              # in/out (double-buffered)
        e += T * D * 4                                   # x_sc carry
        e += 2 * param_bytes                             # params (double-buffered)
        if want_attn:
            e += 2 * n_heads * T * S * jnp.dtype(attn_dtype).itemsize
        if want_bout:
            e += 2 * T * D * xsz
        # rough live f32 intermediates (qkv, conv acc, ctx, per-head scores)
        e += T * 4 * (2 * max(D, Dh, n_qkv) + n_heads * dv + 3 * S)
        return e

    if batch_block is None:
        best = 1
        for d in range(1, B + 1):
            if B % d:
                continue
            if n_tc >= 2 and B >= 2 and B // d < 2:
                continue                                  # >=2 tiles on 2-TC chips
            if est(d) <= 0.7 * budget:
                best = d                                  # largest fitting divisor
        batch_block = best
    assert B % batch_block == 0, "batch_block must divide the batch size"
    Bb = batch_block
    T = Bb * S
    grid = (B // Bb, L)

    def _param_spec(shape):
        nd = len(shape)
        return pl.BlockSpec((1,) + tuple(shape[1:]),
                            lambda bi, li, sc, _nd=nd: (li,) + (0,) * (_nd - 1))

    in_specs = [pl.BlockSpec((Bb, S, D), lambda bi, li, sc: (bi, 0, 0))]
    in_specs += [_param_spec(stacked[n].shape) for n in PARAM_ORDER]

    out_specs = [pl.BlockSpec((Bb, S, D), lambda bi, li, sc: (bi, 0, 0))]
    out_shape = [jax.ShapeDtypeStruct((B, S, D), x.dtype)]
    if want_attn:
        # Compacted head-major layout: [n_needed, H, B, S, S]; slot from SMEM table.
        out_specs.append(pl.BlockSpec(
            (1, n_heads, Bb, S, S),
            lambda bi, li, sc: (sc[1, li], 0, bi, 0, 0)))
        out_shape.append(jax.ShapeDtypeStruct(
            (len(attn_keys), n_heads, B, S, S), attn_dtype))
    if want_bout:
        out_specs.append(pl.BlockSpec(
            (1, Bb, S, D), lambda bi, li, sc: (sc[3, li], bi, 0, 0)))
        out_shape.append(jax.ShapeDtypeStruct((len(bout_keys), B, S, D), x.dtype))

    kernel = functools.partial(
        _fft_coder_kernel, n_heads=n_heads, dk=dk, dv=dv, k_size=k_size,
        norm_first=norm_first, want_attn=want_attn, want_bout=want_bout,
        mm_dtype=mm_dtype, attn_exact=want_attn)

    results = pl.pallas_call(
        kernel,
        grid_spec=pltpu.PrefetchScalarGridSpec(
            num_scalar_prefetch=1,
            grid=grid,
            in_specs=in_specs,
            out_specs=tuple(out_specs),
            scratch_shapes=[pltpu.VMEM((T, D), jnp.float32)]),
        out_shape=tuple(out_shape),
        compiler_params=pltpu.CompilerParams(
            dimension_semantics=("parallel", "arbitrary"),
            vmem_limit_bytes=int(budget)),
        interpret=interpret,
    )(sched, x, *[stacked[n] for n in PARAM_ORDER])

    results = list(results) if isinstance(results, (tuple, list)) else [results]
    y = results[0]
    ridx = 1
    attn_dict, bout_dict = {}, {}
    if want_attn:
        attn_all = results[ridx]
        ridx += 1
        attn_dict = {k: jnp.transpose(attn_all[j], (1, 0, 2, 3))
                     for j, k in enumerate(attn_keys)}
    if want_bout:
        bout_all = results[ridx]
        ridx += 1
        bout_dict = {k: bout_all[j] for j, k in enumerate(bout_keys)}
    return y, attn_dict, bout_dict


# ----------------------------- pure-JAX reference -----------------------------

def fft_coder_ref(x, block_params_list, *, n_heads, dk, dv, k_size,
                  norm_first=True, need_attn=(), need_block_out=()):
    PREC = jax.lax.Precision.HIGHEST
    attn_dict, block_out_dict = {}, {}
    for i, p in enumerate(block_params_list):
        B, S, D = x.shape
        h = _layernorm(x, p["ln1g"], p["ln1b"]) if norm_first else x
        heads, probs = [], []
        for hh in range(n_heads):
            q = jnp.dot(h, p["wq"][hh], precision=PREC) + p["bq"][hh]
            k = jnp.dot(h, p["wk"][hh], precision=PREC) + p["bk"][hh]
            v = jnp.dot(h, p["wv"][hh], precision=PREC) + p["bv"][hh]
            s = jnp.einsum("bqd,bkd->bqk", q, k, precision=PREC) / math.sqrt(dk)
            pr = jax.nn.softmax(s, axis=-1)
            probs.append(pr)
            heads.append(jnp.einsum("bqk,bkd->bqd", pr, v, precision=PREC))
        att = jnp.concatenate(heads, axis=-1)
        wo_full = p["wo"].reshape(n_heads * dv, D)
        att = jnp.dot(att, wo_full, precision=PREC) + p["bo"]
        attn = jnp.stack(probs, axis=1)                         # [B, H, S, S]
        x = x + att
        if not norm_first:
            x = _layernorm(x, p["ln1g"], p["ln1b"])
        h2 = _layernorm(x, p["ln2g"], p["ln2b"]) if norm_first else x
        pad = (k_size - 1) // 2
        Dh = p["w1"].shape[-1]
        h2p = jnp.pad(h2, ((0, 0), (pad, pad), (0, 0)))
        acc1 = jnp.zeros((B, S, Dh), jnp.float32)
        for t in range(k_size):
            acc1 = acc1 + jnp.einsum("bsd,dh->bsh", h2p[:, t:t + S], p["w1"][t],
                                     precision=PREC)
        y1 = jnp.maximum(acc1 + p["b1"], 0.0)
        y1p = jnp.pad(y1, ((0, 0), (pad, pad), (0, 0)))
        acc2 = jnp.zeros((B, S, D), jnp.float32)
        for t in range(k_size):
            acc2 = acc2 + jnp.einsum("bsh,hd->bsd", y1p[:, t:t + S], p["w2"][t],
                                     precision=PREC)
        x = x + acc2 + p["b2"]
        if not norm_first:
            x = _layernorm(x, p["ln2g"], p["ln2b"])
        if i in need_attn:
            attn_dict[i] = attn
        if i in need_block_out:
            block_out_dict[i] = x
    return x, attn_dict, block_out_dict


# ------------------------------ parameter init --------------------------------

def init_block_params(key, in_dim, att_hid_dim, conv_hid_dim, conv_k_size,
                      n_heads, att_out_dim_v):
    """Deterministic synthetic parameters for one FFTBlock (per-head layout)."""
    ks = jax.random.split(key, 12)
    dk, dv = att_hid_dim, att_out_dim_v

    def w(k, shape, fan_in):
        return jax.random.normal(k, shape, jnp.float32) / math.sqrt(fan_in)

    def b(k, shape):
        return 0.1 * jax.random.normal(k, shape, jnp.float32)

    return {
        "ln1g": jnp.ones((1, in_dim), jnp.float32),
        "ln1b": jnp.zeros((1, in_dim), jnp.float32),
        "wq": w(ks[0], (n_heads, in_dim, dk), in_dim),
        "bq": b(ks[1], (n_heads, 1, dk)),
        "wk": w(ks[2], (n_heads, in_dim, dk), in_dim),
        "bk": b(ks[3], (n_heads, 1, dk)),
        "wv": w(ks[4], (n_heads, in_dim, dv), in_dim),
        "bv": b(ks[5], (n_heads, 1, dv)),
        "wo": w(ks[6], (n_heads, dv, in_dim), n_heads * dv),
        "bo": b(ks[7], (1, in_dim)),
        "ln2g": jnp.ones((1, in_dim), jnp.float32),
        "ln2b": jnp.zeros((1, in_dim), jnp.float32),
        "w1": w(ks[8], (conv_k_size, in_dim, conv_hid_dim), in_dim * conv_k_size),
        "b1": b(ks[9], (1, conv_hid_dim)),
        "w2": w(ks[10], (conv_k_size, conv_hid_dim, in_dim), conv_hid_dim * conv_k_size),
        "b2": b(ks[11], (1, in_dim)),
    }


if __name__ == "__main__":
    B, S = 2, 16
    n_blocks = 2
    in_dim, att_hid_dim, conv_hid_dim, conv_k_size = 32, 16, 64, 3
    att_n_heads = 2
    att_out_dim_v = att_hid_dim        # default att_out_dim_v=None -> att_hid_dim

    key = jax.random.PRNGKey(0)
    kx, *kb = jax.random.split(key, 1 + n_blocks)
    Xq = jax.random.normal(kx, (B, S, in_dim), jnp.float32)

    blocks = [
        init_block_params(kb[i], in_dim, att_hid_dim, conv_hid_dim,
                          conv_k_size, att_n_heads, att_out_dim_v)
        for i in range(n_blocks)
    ]

    need_attn = [0, 1]
    need_block_out = [1]
    kwargs = dict(n_heads=att_n_heads, dk=att_hid_dim, dv=att_out_dim_v,
                  k_size=conv_k_size, norm_first=True)

    # pure-JAX reference
    Xr, attn_r, bout_r = fft_coder_ref(Xq, blocks, need_attn=need_attn,
                                       need_block_out=need_block_out, **kwargs)

    # ---- f32-MXU path: strict numerical check ----
    X, attn_dict, block_out_dict = fft_coder(
        Xq, blocks, need_attn=need_attn, need_block_out=need_block_out,
        use_bf16_matmul=False, **kwargs)
    jax.block_until_ready(X)
    assert X.shape == (B, S, in_dim)
    assert attn_dict[0].shape == (B, att_n_heads, S, S)
    assert block_out_dict[1].shape == (B, S, in_dim)
    assert bool(jnp.all(jnp.isfinite(X)))
    assert bool(jnp.allclose(jnp.sum(attn_dict[0], axis=-1), 1.0, atol=1e-3))
    assert bool(jnp.allclose(X, Xr, atol=5e-2, rtol=5e-2)), \
        float(jnp.max(jnp.abs(X - Xr)))
    assert bool(jnp.allclose(block_out_dict[1], bout_r[1], atol=5e-2, rtol=5e-2))
    for i in need_attn:
        assert bool(jnp.allclose(attn_dict[i], attn_r[i], atol=2e-2, rtol=2e-2))

    # ---- no-attn / no-bout variant (gated writes fully skipped) ----
    X2, a2, b2_ = fft_coder(Qq := Xq, blocks, use_bf16_matmul=False, **kwargs)
    jax.block_until_ready(X2)
    assert a2 == {} and b2_ == {}
    assert bool(jnp.allclose(X2, Xr, atol=5e-2, rtol=5e-2))

    # ---- bf16-MXU path (default): loose check ----
    Xb, attn_b, bout_b = fft_coder(
        Xq, blocks, need_attn=need_attn, need_block_out=need_block_out,
        use_bf16_matmul=True, **kwargs)
    jax.block_until_ready(Xb)
    assert bool(jnp.all(jnp.isfinite(Xb)))
    assert bool(jnp.allclose(Xb, Xr, atol=2.5e-1, rtol=2.5e-1))

    print("KERNEL_OK")
</pallas_src>

<mosaic_0001>
module attributes {stable_mosaic.version = 11 : i64} {
  func.func @_fft_coder_kernel(%arg0: i32, %arg1: i32, %arg2: memref<4x2xi32, #tpu.memory_space<smem>>, %arg3: memref<2x16x32xf32, #tpu.memory_space<vmem>>, %arg4: memref<1x1x32xf32, #tpu.memory_space<vmem>>, %arg5: memref<1x1x32xf32, #tpu.memory_space<vmem>>, %arg6: memref<1x32x96xf32, #tpu.memory_space<vmem>>, %arg7: memref<1x1x96xf32, #tpu.memory_space<vmem>>, %arg8: memref<1x32x32xf32, #tpu.memory_space<vmem>>, %arg9: memref<1x1x32xf32, #tpu.memory_space<vmem>>, %arg10: memref<1x1x32xf32, #tpu.memory_space<vmem>>, %arg11: memref<1x1x32xf32, #tpu.memory_space<vmem>>, %arg12: memref<1x3x32x64xf32, #tpu.memory_space<vmem>>, %arg13: memref<1x1x64xf32, #tpu.memory_space<vmem>>, %arg14: memref<1x3x64x32xf32, #tpu.memory_space<vmem>>, %arg15: memref<1x1x32xf32, #tpu.memory_space<vmem>>, %arg16: memref<2x16x32xf32, #tpu.memory_space<vmem>>, %arg17: memref<1x2x2x16x16xf32, #tpu.memory_space<vmem>>, %arg18: memref<1x2x16x32xf32, #tpu.memory_space<vmem>>, %arg19: memref<32x32xf32, #tpu.memory_space<vmem>>) attributes {dimension_semantics = [#tpu.dimension_semantics<parallel>, #tpu.dimension_semantics<arbitrary>], iteration_bounds = array<i64: 1, 2>, scalar_prefetch = 1 : i64, scratch_operands = 1 : i64, tpu.core_type = #tpu.core_type<tc>, window_params = [{transform_indices = @transform_0, window_bounds = array<i64: 2, 16, 32>}, {transform_indices = @transform_1, window_bounds = array<i64: 1, 1, 32>}, {transform_indices = @transform_2, window_bounds = array<i64: 1, 1, 32>}, {transform_indices = @transform_3, window_bounds = array<i64: 1, 32, 96>}, {transform_indices = @transform_4, window_bounds = array<i64: 1, 1, 96>}, {transform_indices = @transform_5, window_bounds = array<i64: 1, 32, 32>}, {transform_indices = @transform_6, window_bounds = array<i64: 1, 1, 32>}, {transform_indices = @transform_7, window_bounds = array<i64: 1, 1, 32>}, {transform_indices = @transform_8, window_bounds = array<i64: 1, 1, 32>}, {transform_indices = @transform_9, window_bounds = array<i64: 1, 3, 32, 64>}, {transform_indices = @transform_10, window_bounds = array<i64: 1, 1, 64>}, {transform_indices = @transform_11, window_bounds = array<i64: 1, 3, 64, 32>}, {transform_indices = @transform_12, window_bounds = array<i64: 1, 1, 32>}, {transform_indices = @transform_13, window_bounds = array<i64: 2, 16, 32>}, {transform_indices = @transform_14, window_bounds = array<i64: 1, 2, 2, 16, 16>}, {transform_indices = @transform_15, window_bounds = array<i64: 1, 2, 16, 32>}]} {
    %c0_i32 = arith.constant 0 : i32
    %0 = arith.cmpi eq, %arg1, %c0_i32 : i32
    %1 = arith.extui %0 : i1 to i32
    %c0_i32_0 = arith.constant 0 : i32
    %2 = arith.cmpi ne, %1, %c0_i32_0 : i32
    scf.if %2 {
      %c0_114 = arith.constant 0 : index
      %c0_115 = arith.constant 0 : index
      %c0_116 = arith.constant 0 : index
      %232 = vector.load %arg3[%c0_114, %c0_115, %c0_116] : memref<2x16x32xf32, #tpu.memory_space<vmem>>, vector<2x16x32xf32>
      %233 = vector.shape_cast %232 : vector<2x16x32xf32> to vector<32x32xf32>
      %c0_117 = arith.constant 0 : index
      %c0_118 = arith.constant 0 : index
      %234 = vector.load %arg19[%c0_117, %c0_118] : memref<32x32xf32, #tpu.memory_space<vmem>>, vector<32x32xf32>
      tpu.vector_store %arg19[%c0_117, %c0_118], %233 {strides = array<i32>} : memref<32x32xf32, #tpu.memory_space<vmem>>, vector<32x32xf32>,
    } else {
    }
    %c0 = arith.constant 0 : index
    %c0_1 = arith.constant 0 : index
    %3 = vector.load %arg19[%c0, %c0_1] : memref<32x32xf32, #tpu.memory_space<vmem>>, vector<32x32xf32>
    %c0_2 = arith.constant 0 : index
    %c0_3 = arith.constant 0 : index
    %c0_4 = arith.constant 0 : index
    %4 = vector.load %arg4[%c0_2, %c0_3, %c0_4] : memref<1x1x32xf32, #tpu.memory_space<vmem>>, vector<1x1x32xf32>
    %5 = vector.shape_cast %4 : vector<1x1x32xf32> to vector<1x32xf32>
    %c0_5 = arith.constant 0 : index
    %c0_6 = arith.constant 0 : index
    %c0_7 = arith.constant 0 : index
    %6 = vector.load %arg5[%c0_5, %c0_6, %c0_7] : memref<1x1x32xf32, #tpu.memory_space<vmem>>, vector<1x1x32xf32>
    %7 = vector.shape_cast %6 : vector<1x1x32xf32> to vector<1x32xf32>
    %cst = arith.constant dense<0.000000e+00> : vector<32xf32>
    %8 = vector.multi_reduction <add>, %3, %cst [1] : vector<32x32xf32> to vector<32xf32>
    %9 = vector.shape_cast %8 : vector<32xf32> to vector<32x1xf32>
    %cst_8 = arith.constant 3.200000e+01 : f32
    %10 = vector.broadcast %cst_8 : f32 to vector<32x1xf32>
    %11 = arith.divf %9, %10 : vector<32x1xf32>
    %12 = vector.broadcast %11 : vector<32x1xf32> to vector<32x32xf32>
    %13 = arith.subf %3, %12 : vector<32x32xf32>
    %14 = arith.mulf %13, %13 : vector<32x32xf32>
    %cst_9 = arith.constant dense<0.000000e+00> : vector<32xf32>
    %15 = vector.multi_reduction <add>, %14, %cst_9 [1] : vector<32x32xf32> to vector<32xf32>
    %16 = vector.shape_cast %15 : vector<32xf32> to vector<32x1xf32>
    %cst_10 = arith.constant 3.200000e+01 : f32
    %17 = vector.broadcast %cst_10 : f32 to vector<32x1xf32>
    %18 = arith.divf %16, %17 : vector<32x1xf32>
    %19 = vector.broadcast %11 : vector<32x1xf32> to vector<32x32xf32>
    %20 = arith.subf %3, %19 : vector<32x32xf32>
    %cst_11 = arith.constant 9.99999974E-6 : f32
    %21 = vector.broadcast %cst_11 : f32 to vector<32x1xf32>
    %22 = arith.addf %18, %21 : vector<32x1xf32>
    %23 = math.rsqrt %22 : vector<32x1xf32>
    %24 = vector.broadcast %23 : vector<32x1xf32> to vector<32x32xf32>
    %25 = arith.mulf %20, %24 : vector<32x32xf32>
    %26 = vector.broadcast %5 : vector<1x32xf32> to vector<32x32xf32>
    %27 = arith.mulf %25, %26 : vector<32x32xf32>
    %28 = vector.broadcast %7 : vector<1x32xf32> to vector<32x32xf32>
    %29 = arith.addf %27, %28 : vector<32x32xf32>
    %c0_12 = arith.constant 0 : index
    %c0_13 = arith.constant 0 : index
    %c0_14 = arith.constant 0 : index
    %30 = vector.load %arg6[%c0_12, %c0_13, %c0_14] : memref<1x32x96xf32, #tpu.memory_space<vmem>>, vector<1x32x96xf32>
    %31 = vector.shape_cast %30 : vector<1x32x96xf32> to vector<32x96xf32>
    %cst_15 = arith.constant dense<0.000000e+00> : vector<32x96xf32>
    %32 = tpu.matmul %29, %31, %cst_15 {dimension_numbers = #tpu.dot_dimension_numbers<[1], [0], [0], [1], [0, 0, 1, 1], [], []>} : vector<32x32xf32>, vector<32x96xf32>, vector<32x96xf32> -> vector<32x96xf32>
    %c0_16 = arith.constant 0 : index
    %c0_17 = arith.constant 0 : index
    %c0_18 = arith.constant 0 : index
    %33 = vector.load %arg7[%c0_16, %c0_17, %c0_18] : memref<1x1x96xf32, #tpu.memory_space<vmem>>, vector<1x1x96xf32>
    %34 = vector.shape_cast %33 : vector<1x1x96xf32> to vector<1x96xf32>
    %35 = vector.broadcast %34 : vector<1x96xf32> to vector<32x96xf32>
    %36 = arith.addf %32, %35 : vector<32x96xf32>
    %37 = vector.extract_strided_slice %36 {offsets = [0, 0], sizes = [32, 32], strides = [1, 1]} : vector<32x96xf32> to vector<32x32xf32>
    %38 = vector.extract_strided_slice %36 {offsets = [0, 32], sizes = [32, 32], strides = [1, 1]} : vector<32x96xf32> to vector<32x32xf32>
    %39 = vector.extract_strided_slice %36 {offsets = [0, 64], sizes = [32, 32], strides = [1, 1]} : vector<32x96xf32> to vector<32x32xf32>
    %c0_19 = arith.constant 0 : index
    %40 = arith.index_cast %arg1 : i32 to index
    %41 = memref.load %arg2[%c0_19, %40] : memref<4x2xi32, #tpu.memory_space<smem>>
    %42 = vector.extract_strided_slice %37 {offsets = [0, 0], sizes = [32, 16], strides = [1, 1]} : vector<32x32xf32> to vector<32x16xf32>
    %43 = vector.shape_cast %42 : vector<32x16xf32> to vector<2x16x16xf32>
    %44 = vector.extract_strided_slice %38 {offsets = [0, 0], sizes = [32, 16], strides = [1, 1]} : vector<32x32xf32> to vector<32x16xf32>
    %45 = vector.shape_cast %44 : vector<32x16xf32> to vector<2x16x16xf32>
    %46 = vector.extract_strided_slice %39 {offsets = [0, 0], sizes = [32, 16], strides = [1, 1]} : vector<32x32xf32> to vector<32x16xf32>
    %47 = vector.shape_cast %46 : vector<32x16xf32> to vector<2x16x16xf32>
    "tpu.trace_start"() <{level = 10 : i32, message = "bqd,bkd->bqk"}> : () -> ()
    %cst_20 = arith.constant dense<0.000000e+00> : vector<2x16x16xf32>
    %48 = tpu.matmul %43, %45, %cst_20 {dimension_numbers = #tpu.dot_dimension_numbers<[2], [2], [1], [1], [0, 0, 0, 1, 1, 1], [0], [0]>} : vector<2x16x16xf32>, vector<2x16x16xf32>, vector<2x16x16xf32> -> vector<2x16x16xf32>
    "tpu.trace_stop"() : () -> ()
    %cst_21 = arith.constant 2.500000e-01 : f32
    %49 = vector.broadcast %cst_21 : f32 to vector<2x16x16xf32>
    %50 = arith.mulf %48, %49 : vector<2x16x16xf32>
    %cst_22 = arith.constant dense<0xFF800000> : vector<2x16xf32>
    %51 = vector.multi_reduction <maximumf>, %50, %cst_22 [2] : vector<2x16x16xf32> to vector<2x16xf32>
    %52 = vector.shape_cast %51 : vector<2x16xf32> to vector<2x16x1xf32>
    %53 = vector.broadcast %52 : vector<2x16x1xf32> to vector<2x16x16xf32>
    %54 = arith.subf %50, %53 : vector<2x16x16xf32>
    %55 = math.exp %54 : vector<2x16x16xf32>
    %cst_23 = arith.constant dense<0.000000e+00> : vector<2x16xf32>
    %56 = vector.multi_reduction <add>, %55, %cst_23 [2] : vector<2x16x16xf32> to vector<2x16xf32>
    %57 = vector.shape_cast %56 : vector<2x16xf32> to vector<2x16x1xf32>
    %58 = tpu.reciprocal %57 : vector<2x16x1xf32> -> vector<2x16x1xf32>
    %59 = vector.broadcast %58 : vector<2x16x1xf32> to vector<2x16x16xf32>
    %60 = arith.mulf %55, %59 : vector<2x16x16xf32>
    %c1_i32 = arith.constant 1 : i32
    %61 = arith.cmpi eq, %41, %c1_i32 : i32
    %62 = arith.extui %61 : i1 to i32
    %c0_i32_24 = arith.constant 0 : i32
    %63 = arith.cmpi ne, %62, %c0_i32_24 : i32
    scf.if %63 {
      %c0_114 = arith.constant 0 : index
      %c0_115 = arith.constant 0 : index
      %c0_116 = arith.constant 0 : index
      %c0_117 = arith.constant 0 : index
      %c0_118 = arith.constant 0 : index
      %232 = vector.load %arg17[%c0_114, %c0_115, %c0_116, %c0_117, %c0_118] : memref<1x2x2x16x16xf32, #tpu.memory_space<vmem>>, vector<1x1x2x16x16xf32>
      %233 = vector.shape_cast %232 : vector<1x1x2x16x16xf32> to vector<2x16x16xf32>
      %234 = vector.shape_cast %60 : vector<2x16x16xf32> to vector<1x1x2x16x16xf32>
      tpu.vector_store %arg17[%c0_114, %c0_115, %c0_116, %c0_117, %c0_118], %234 {strides = array<i32>} : memref<1x2x2x16x16xf32, #tpu.memory_space<vmem>>, vector<1x1x2x16x16xf32>,
    } else {
    }
    "tpu.trace_start"() <{level = 10 : i32, message = "bqk,bkd->bqd"}> : () -> ()
    %cst_25 = arith.constant dense<0.000000e+00> : vector<2x16x16xf32>
    %64 = tpu.matmul %60, %47, %cst_25 {dimension_numbers = #tpu.dot_dimension_numbers<[2], [1], [1], [2], [0, 0, 0, 1, 1, 2], [0], [0]>} : vector<2x16x16xf32>, vector<2x16x16xf32>, vector<2x16x16xf32> -> vector<2x16x16xf32>
    "tpu.trace_stop"() : () -> ()
    %65 = vector.shape_cast %64 : vector<2x16x16xf32> to vector<32x16xf32>
    %66 = vector.extract_strided_slice %37 {offsets = [0, 16], sizes = [32, 16], strides = [1, 1]} : vector<32x32xf32> to vector<32x16xf32>
    %67 = vector.shape_cast %66 : vector<32x16xf32> to vector<2x16x16xf32>
    %68 = vector.extract_strided_slice %38 {offsets = [0, 16], sizes = [32, 16], strides = [1, 1]} : vector<32x32xf32> to vector<32x16xf32>
    %69 = vector.shape_cast %68 : vector<32x16xf32> to vector<2x16x16xf32>
    %70 = vector.extract_strided_slice %39 {offsets = [0, 16], sizes = [32, 16], strides = [1, 1]} : vector<32x32xf32> to vector<32x16xf32>
    %71 = vector.shape_cast %70 : vector<32x16xf32> to vector<2x16x16xf32>
    "tpu.trace_start"() <{level = 10 : i32, message = "bqd,bkd->bqk"}> : () -> ()
    %cst_26 = arith.constant dense<0.000000e+00> : vector<2x16x16xf32>
    %72 = tpu.matmul %67, %69, %cst_26 {dimension_numbers = #tpu.dot_dimension_numbers<[2], [2], [1], [1], [0, 0, 0, 1, 1, 1], [0], [0]>} : vector<2x16x16xf32>, vector<2x16x16xf32>, vector<2x16x16xf32> -> vector<2x16x16xf32>
    "tpu.trace_stop"() : () -> ()
    %cst_27 = arith.constant 2.500000e-01 : f32
    %73 = vector.broadcast %cst_27 : f32 to vector<2x16x16xf32>
    %74 = arith.mulf %72, %73 : vector<2x16x16xf32>
    %cst_28 = arith.constant dense<0xFF800000> : vector<2x16xf32>
    %75 = vector.multi_reduction <maximumf>, %74, %cst_28 [2] : vector<2x16x16xf32> to vector<2x16xf32>
    %76 = vector.shape_cast %75 : vector<2x16xf32> to vector<2x16x1xf32>
    %77 = vector.broadcast %76 : vector<2x16x1xf32> to vector<2x16x16xf32>
    %78 = arith.subf %74, %77 : vector<2x16x16xf32>
    %79 = math.exp %78 : vector<2x16x16xf32>
    %cst_29 = arith.constant dense<0.000000e+00> : vector<2x16xf32>
    %80 = vector.multi_reduction <add>, %79, %cst_29 [2] : vector<2x16x16xf32> to vector<2x16xf32>
    %81 = vector.shape_cast %80 : vector<2x16xf32> to vector<2x16x1xf32>
    %82 = tpu.reciprocal %81 : vector<2x16x1xf32> -> vector<2x16x1xf32>
    %83 = vector.broadcast %82 : vector<2x16x1xf32> to vector<2x16x16xf32>
    %84 = arith.mulf %79, %83 : vector<2x16x16xf32>
    %c1_i32_30 = arith.constant 1 : i32
    %85 = arith.cmpi eq, %41, %c1_i32_30 : i32
    %86 = arith.extui %85 : i1 to i32
    %c0_i32_31 = arith.constant 0 : i32
    %87 = arith.cmpi ne, %86, %c0_i32_31 : i32
    scf.if %87 {
      %c0_114 = arith.constant 0 : index
      %c1_115 = arith.constant 1 : index
      %c0_116 = arith.constant 0 : index
      %c0_117 = arith.constant 0 : index
      %c0_118 = arith.constant 0 : index
      %232 = vector.load %arg17[%c0_114, %c1_115, %c0_116, %c0_117, %c0_118] : memref<1x2x2x16x16xf32, #tpu.memory_space<vmem>>, vector<1x1x2x16x16xf32>
      %233 = vector.shape_cast %232 : vector<1x1x2x16x16xf32> to vector<2x16x16xf32>
      %234 = vector.shape_cast %84 : vector<2x16x16xf32> to vector<1x1x2x16x16xf32>
      tpu.vector_store %arg17[%c0_114, %c1_115, %c0_116, %c0_117, %c0_118], %234 {strides = array<i32>} : memref<1x2x2x16x16xf32, #tpu.memory_space<vmem>>, vector<1x1x2x16x16xf32>,
    } else {
    }
    "tpu.trace_start"() <{level = 10 : i32, message = "bqk,bkd->bqd"}> : () -> ()
    %cst_32 = arith.constant dense<0.000000e+00> : vector<2x16x16xf32>
    %88 = tpu.matmul %84, %71, %cst_32 {dimension_numbers = #tpu.dot_dimension_numbers<[2], [1], [1], [2], [0, 0, 0, 1, 1, 2], [0], [0]>} : vector<2x16x16xf32>, vector<2x16x16xf32>, vector<2x16x16xf32> -> vector<2x16x16xf32>
    "tpu.trace_stop"() : () -> ()
    %89 = vector.shape_cast %88 : vector<2x16x16xf32> to vector<32x16xf32>
    %90 = tpu.concatenate %65, %89 in 1 : vector<32x16xf32>, vector<32x16xf32> -> vector<32x32xf32>
    %c0_33 = arith.constant 0 : index
    %c0_34 = arith.constant 0 : index
    %c0_35 = arith.constant 0 : index
    %91 = vector.load %arg8[%c0_33, %c0_34, %c0_35] : memref<1x32x32xf32, #tpu.memory_space<vmem>>, vector<1x32x32xf32>
    %92 = vector.shape_cast %91 : vector<1x32x32xf32> to vector<32x32xf32>
    %cst_36 = arith.constant dense<0.000000e+00> : vector<32x32xf32>
    %93 = tpu.matmul %90, %92, %cst_36 {dimension_numbers = #tpu.dot_dimension_numbers<[1], [0], [0], [1], [0, 0, 1, 1], [], []>} : vector<32x32xf32>, vector<32x32xf32>, vector<32x32xf32> -> vector<32x32xf32>
    %94 = arith.addf %3, %93 : vector<32x32xf32>
    %c0_37 = arith.constant 0 : index
    %c0_38 = arith.constant 0 : index
    %c0_39 = arith.constant 0 : index
    %95 = vector.load %arg9[%c0_37, %c0_38, %c0_39] : memref<1x1x32xf32, #tpu.memory_space<vmem>>, vector<1x1x32xf32>
    %96 = vector.shape_cast %95 : vector<1x1x32xf32> to vector<1x32xf32>
    %97 = vector.broadcast %96 : vector<1x32xf32> to vector<32x32xf32>
    %98 = arith.addf %94, %97 : vector<32x32xf32>
    %c0_40 = arith.constant 0 : index
    %c0_41 = arith.constant 0 : index
    %c0_42 = arith.constant 0 : index
    %99 = vector.load %arg10[%c0_40, %c0_41, %c0_42] : memref<1x1x32xf32, #tpu.memory_space<vmem>>, vector<1x1x32xf32>
    %100 = vector.shape_cast %99 : vector<1x1x32xf32> to vector<1x32xf32>
    %c0_43 = arith.constant 0 : index
    %c0_44 = arith.constant 0 : index
    %c0_45 = arith.constant 0 : index
    %101 = vector.load %arg11[%c0_43, %c0_44, %c0_45] : memref<1x1x32xf32, #tpu.memory_space<vmem>>, vector<1x1x32xf32>
    %102 = vector.shape_cast %101 : vector<1x1x32xf32> to vector<1x32xf32>
    %cst_46 = arith.constant dense<0.000000e+00> : vector<32xf32>
    %103 = vector.multi_reduction <add>, %98, %cst_46 [1] : vector<32x32xf32> to vector<32xf32>
    %104 = vector.shape_cast %103 : vector<32xf32> to vector<32x1xf32>
    %cst_47 = arith.constant 3.200000e+01 : f32
    %105 = vector.broadcast %cst_47 : f32 to vector<32x1xf32>
    %106 = arith.divf %104, %105 : vector<32x1xf32>
    %107 = vector.broadcast %106 : vector<32x1xf32> to vector<32x32xf32>
    %108 = arith.subf %98, %107 : vector<32x32xf32>
    %109 = arith.mulf %108, %108 : vector<32x32xf32>
    %cst_48 = arith.constant dense<0.000000e+00> : vector<32xf32>
    %110 = vector.multi_reduction <add>, %109, %cst_48 [1] : vector<32x32xf32> to vector<32xf32>
    %111 = vector.shape_cast %110 : vector<32xf32> to vector<32x1xf32>
    %cst_49 = arith.constant 3.200000e+01 : f32
    %112 = vector.broadcast %cst_49 : f32 to vector<32x1xf32>
    %113 = arith.divf %111, %112 : vector<32x1xf32>
    %114 = vector.broadcast %106 : vector<32x1xf32> to vector<32x32xf32>
    %115 = arith.subf %98, %114 : vector<32x32xf32>
    %cst_50 = arith.constant 9.99999974E-6 : f32
    %116 = vector.broadcast %cst_50 : f32 to vector<32x1xf32>
    %117 = arith.addf %113, %116 : vector<32x1xf32>
    %118 = math.rsqrt %117 : vector<32x1xf32>
    %119 = vector.broadcast %118 : vector<32x1xf32> to vector<32x32xf32>
    %120 = arith.mulf %115, %119 : vector<32x32xf32>
    %121 = vector.broadcast %100 : vector<1x32xf32> to vector<32x32xf32>
    %122 = arith.mulf %120, %121 : vector<32x32xf32>
    %123 = vector.broadcast %102 : vector<1x32xf32> to vector<32x32xf32>
    %124 = arith.addf %122, %123 : vector<32x32xf32>
    %125 = tpu.iota {dimensions = array<i32: 0>} : vector<32x1xi32>
    %c16_i32 = arith.constant 16 : i32
    %c0_i32_51 = arith.constant 0 : i32
    %126 = arith.cmpi eq, %c16_i32, %c0_i32_51 : i32
    %c1_i32_52 = arith.constant 1 : i32
    %127 = arith.select %126, %c1_i32_52, %c16_i32 : i32
    %128 = vector.broadcast %127 : i32 to vector<32x1xi32>
    %129 = arith.remsi %125, %128 : vector<32x1xi32>
    %c0_i32_53 = arith.constant 0 : i32
    %130 = vector.broadcast %c0_i32_53 : i32 to vector<32x1xi32>
    %131 = arith.cmpi ne, %129, %130 : vector<32x1xi32>
    %c0_i32_54 = arith.constant 0 : i32
    %132 = vector.broadcast %c0_i32_54 : i32 to vector<32x1xi32>
    %133 = arith.cmpi slt, %129, %132 : vector<32x1xi32>
    %c0_i32_55 = arith.constant 0 : i32
    %134 = arith.cmpi slt, %127, %c0_i32_55 : i32
    %135 = vector.broadcast %134 : i1 to vector<32x1xi1>
    %136 = vector.broadcast %135 : vector<32x1xi1> to vector<32x1xi1>
    %137 = arith.xori %133, %136 : vector<32x1xi1>
    %138 = arith.andi %137, %131 : vector<32x1xi1>
    %139 = vector.broadcast %127 : i32 to vector<32x1xi32>
    %140 = arith.addi %129, %139 : vector<32x1xi32>
    %141 = arith.select %138, %140, %129 : vector<32x1xi1>, vector<32x1xi32>
    %c1_i32_56 = arith.constant 1 : i32
    %142 = vector.broadcast %c1_i32_56 : i32 to vector<32x1xi32>
    %143 = arith.addi %141, %142 : vector<32x1xi32>
    %c0_i32_57 = arith.constant 0 : i32
    %144 = vector.broadcast %c0_i32_57 : i32 to vector<32x1xi32>
    %145 = arith.cmpi sge, %143, %144 : vector<32x1xi32>
    %c1_i32_58 = arith.constant 1 : i32
    %146 = vector.broadcast %c1_i32_58 : i32 to vector<32x1xi32>
    %147 = arith.addi %141, %146 : vector<32x1xi32>
    %c16_i32_59 = arith.constant 16 : i32
    %148 = vector.broadcast %c16_i32_59 : i32 to vector<32x1xi32>
    %149 = arith.cmpi slt, %147, %148 : vector<32x1xi32>
    %150 = arith.andi %145, %149 : vector<32x1xi1>
    %c-1_i32 = arith.constant -1 : i32
    %151 = vector.broadcast %c-1_i32 : i32 to vector<32x1xi32>
    %152 = arith.addi %141, %151 : vector<32x1xi32>
    %c0_i32_60 = arith.constant 0 : i32
    %153 = vector.broadcast %c0_i32_60 : i32 to vector<32x1xi32>
    %154 = arith.cmpi sge, %152, %153 : vector<32x1xi32>
    %c-1_i32_61 = arith.constant -1 : i32
    %155 = vector.broadcast %c-1_i32_61 : i32 to vector<32x1xi32>
    %156 = arith.addi %141, %155 : vector<32x1xi32>
    %c16_i32_62 = arith.constant 16 : i32
    %157 = vector.broadcast %c16_i32_62 : i32 to vector<32x1xi32>
    %158 = arith.cmpi slt, %156, %157 : vector<32x1xi32>
    %159 = arith.andi %154, %158 : vector<32x1xi1>
    %cst_63 = arith.constant 0.000000e+00 : f32
    %160 = vector.broadcast %cst_63 : f32 to vector<32x64xf32>
    %c1_i32_64 = arith.constant 1 : i32
    %161 = tpu.dynamic_rotate %124 by %c1_i32_64 dim 0 : vector<32x32xf32>, i32 -> vector<32x32xf32>
    %c0_i32_65 = arith.constant 0 : i32
    %162 = arith.sitofp %c0_i32_65 : i32 to f32
    %163 = vector.shape_cast %159 : vector<32x1xi1> to vector<32x1xi1>
    %164 = vector.broadcast %163 : vector<32x1xi1> to vector<32x32xi1>
    %165 = vector.broadcast %162 : f32 to vector<32x32xf32>
    %166 = arith.select %164, %161, %165 : vector<32x32xi1>, vector<32x32xf32>
    %c0_66 = arith.constant 0 : index
    %c0_67 = arith.constant 0 : index
    %c0_68 = arith.constant 0 : index
    %c0_69 = arith.constant 0 : index
    %167 = vector.load %arg12[%c0_66, %c0_67, %c0_68, %c0_69] : memref<1x3x32x64xf32, #tpu.memory_space<vmem>>, vector<1x1x32x64xf32>
    %168 = vector.shape_cast %167 : vector<1x1x32x64xf32> to vector<32x64xf32>
    %cst_70 = arith.constant dense<0.000000e+00> : vector<32x64xf32>
    %169 = tpu.matmul %166, %168, %cst_70 {dimension_numbers = #tpu.dot_dimension_numbers<[1], [0], [0], [1], [0, 0, 1, 1], [], []>} : vector<32x32xf32>, vector<32x64xf32>, vector<32x64xf32> -> vector<32x64xf32>
    %170 = arith.addf %160, %169 : vector<32x64xf32>
    %c0_71 = arith.constant 0 : index
    %c1 = arith.constant 1 : index
    %c0_72 = arith.constant 0 : index
    %c0_73 = arith.constant 0 : index
    %171 = vector.load %arg12[%c0_71, %c1, %c0_72, %c0_73] : memref<1x3x32x64xf32, #tpu.memory_space<vmem>>, vector<1x1x32x64xf32>
    %172 = vector.shape_cast %171 : vector<1x1x32x64xf32> to vector<32x64xf32>
    %cst_74 = arith.constant dense<0.000000e+00> : vector<32x64xf32>
    %173 = tpu.matmul %124, %172, %cst_74 {dimension_numbers = #tpu.dot_dimension_numbers<[1], [0], [0], [1], [0, 0, 1, 1], [], []>} : vector<32x32xf32>, vector<32x64xf32>, vector<32x64xf32> -> vector<32x64xf32>
    %174 = arith.addf %170, %173 : vector<32x64xf32>
    %c31_i32 = arith.constant 31 : i32
    %175 = tpu.dynamic_rotate %124 by %c31_i32 dim 0 : vector<32x32xf32>, i32 -> vector<32x32xf32>
    %c0_i32_75 = arith.constant 0 : i32
    %176 = arith.sitofp %c0_i32_75 : i32 to f32
    %177 = vector.shape_cast %150 : vector<32x1xi1> to vector<32x1xi1>
    %178 = vector.broadcast %177 : vector<32x1xi1> to vector<32x32xi1>
    %179 = vector.broadcast %176 : f32 to vector<32x32xf32>
    %180 = arith.select %178, %175, %179 : vector<32x32xi1>, vector<32x32xf32>
    %c0_76 = arith.constant 0 : index
    %c2 = arith.constant 2 : index
    %c0_77 = arith.constant 0 : index
    %c0_78 = arith.constant 0 : index
    %181 = vector.load %arg12[%c0_76, %c2, %c0_77, %c0_78] : memref<1x3x32x64xf32, #tpu.memory_space<vmem>>, vector<1x1x32x64xf32>
    %182 = vector.shape_cast %181 : vector<1x1x32x64xf32> to vector<32x64xf32>
    %cst_79 = arith.constant dense<0.000000e+00> : vector<32x64xf32>
    %183 = tpu.matmul %180, %182, %cst_79 {dimension_numbers = #tpu.dot_dimension_numbers<[1], [0], [0], [1], [0, 0, 1, 1], [], []>} : vector<32x32xf32>, vector<32x64xf32>, vector<32x64xf32> -> vector<32x64xf32>
    %184 = arith.addf %174, %183 : vector<32x64xf32>
    %c0_80 = arith.constant 0 : index
    %c0_81 = arith.constant 0 : index
    %c0_82 = arith.constant 0 : index
    %185 = vector.load %arg13[%c0_80, %c0_81, %c0_82] : memref<1x1x64xf32, #tpu.memory_space<vmem>>, vector<1x1x64xf32>
    %186 = vector.shape_cast %185 : vector<1x1x64xf32> to vector<1x64xf32>
    %187 = vector.broadcast %186 : vector<1x64xf32> to vector<32x64xf32>
    %188 = arith.addf %184, %187 : vector<32x64xf32>
    %cst_83 = arith.constant 0.000000e+00 : f32
    %189 = vector.broadcast %cst_83 : f32 to vector<32x64xf32>
    %190 = arith.maximumf %188, %189 : vector<32x64xf32>
    %cst_84 = arith.constant 0.000000e+00 : f32
    %191 = vector.broadcast %cst_84 : f32 to vector<32x32xf32>
    %c0_85 = arith.constant 0 : index
    %c0_86 = arith.constant 0 : index
    %c0_87 = arith.constant 0 : index
    %c0_88 = arith.constant 0 : index
    %192 = vector.load %arg14[%c0_85, %c0_86, %c0_87, %c0_88] : memref<1x3x64x32xf32, #tpu.memory_space<vmem>>, vector<1x1x64x32xf32>
    %193 = vector.shape_cast %192 : vector<1x1x64x32xf32> to vector<64x32xf32>
    %cst_89 = arith.constant dense<0.000000e+00> : vector<32x32xf32>
    %194 = tpu.matmul %190, %193, %cst_89 {dimension_numbers = #tpu.dot_dimension_numbers<[1], [0], [0], [1], [0, 0, 1, 1], [], []>} : vector<32x64xf32>, vector<64x32xf32>, vector<32x32xf32> -> vector<32x32xf32>
    %c1_i32_90 = arith.constant 1 : i32
    %195 = tpu.dynamic_rotate %194 by %c1_i32_90 dim 0 : vector<32x32xf32>, i32 -> vector<32x32xf32>
    %c0_i32_91 = arith.constant 0 : i32
    %196 = arith.sitofp %c0_i32_91 : i32 to f32
    %197 = vector.shape_cast %159 : vector<32x1xi1> to vector<32x1xi1>
    %198 = vector.broadcast %197 : vector<32x1xi1> to vector<32x32xi1>
    %199 = vector.broadcast %196 : f32 to vector<32x32xf32>
    %200 = arith.select %198, %195, %199 : vector<32x32xi1>, vector<32x32xf32>
    %201 = arith.addf %191, %200 : vector<32x32xf32>
    %c0_92 = arith.constant 0 : index
    %c1_93 = arith.constant 1 : index
    %c0_94 = arith.constant 0 : index
    %c0_95 = arith.constant 0 : index
    %202 = vector.load %arg14[%c0_92, %c1_93, %c0_94, %c0_95] : memref<1x3x64x32xf32, #tpu.memory_space<vmem>>, vector<1x1x64x32xf32>
    %203 = vector.shape_cast %202 : vector<1x1x64x32xf32> to vector<64x32xf32>
    %cst_96 = arith.constant dense<0.000000e+00> : vector<32x32xf32>
    %204 = tpu.matmul %190, %203, %cst_96 {dimension_numbers = #tpu.dot_dimension_numbers<[1], [0], [0], [1], [0, 0, 1, 1], [], []>} : vector<32x64xf32>, vector<64x32xf32>, vector<32x32xf32> -> vector<32x32xf32>
    %205 = arith.addf %201, %204 : vector<32x32xf32>
    %c0_97 = arith.constant 0 : index
    %c2_98 = arith.constant 2 : index
    %c0_99 = arith.constant 0 : index
    %c0_100 = arith.constant 0 : index
    %206 = vector.load %arg14[%c0_97, %c2_98, %c0_99, %c0_100] : memref<1x3x64x32xf32, #tpu.memory_space<vmem>>, vector<1x1x64x32xf32>
    %207 = vector.shape_cast %206 : vector<1x1x64x32xf32> to vector<64x32xf32>
    %cst_101 = arith.constant dense<0.000000e+00> : vector<32x32xf32>
    %208 = tpu.matmul %190, %207, %cst_101 {dimension_numbers = #tpu.dot_dimension_numbers<[1], [0], [0], [1], [0, 0, 1, 1], [], []>} : vector<32x64xf32>, vector<64x32xf32>, vector<32x32xf32> -> vector<32x32xf32>
    %c31_i32_102 = arith.constant 31 : i32
    %209 = tpu.dynamic_rotate %208 by %c31_i32_102 dim 0 : vector<32x32xf32>, i32 -> vector<32x32xf32>
    %c0_i32_103 = arith.constant 0 : i32
    %210 = arith.sitofp %c0_i32_103 : i32 to f32
    %211 = vector.shape_cast %150 : vector<32x1xi1> to vector<32x1xi1>
    %212 = vector.broadcast %211 : vector<32x1xi1> to vector<32x32xi1>
    %213 = vector.broadcast %210 : f32 to vector<32x32xf32>
    %214 = arith.select %212, %209, %213 : vector<32x32xi1>, vector<32x32xf32>
    %215 = arith.addf %205, %214 : vector<32x32xf32>
    %216 = arith.addf %98, %215 : vector<32x32xf32>
    %c0_104 = arith.constant 0 : index
    %c0_105 = arith.constant 0 : index
    %c0_106 = arith.constant 0 : index
    %217 = vector.load %arg15[%c0_104, %c0_105, %c0_106] : memref<1x1x32xf32, #tpu.memory_space<vmem>>, vector<1x1x32xf32>
    %218 = vector.shape_cast %217 : vector<1x1x32xf32> to vector<1x32xf32>
    %219 = vector.broadcast %218 : vector<1x32xf32> to vector<32x32xf32>
    %220 = arith.addf %216, %219 : vector<32x32xf32>
    %c1_i32_107 = arith.constant 1 : i32
    %221 = arith.cmpi slt, %arg1, %c1_i32_107 : i32
    %222 = arith.extui %221 : i1 to i32
    %c0_i32_108 = arith.constant 0 : i32
    %223 = arith.cmpi ne, %222, %c0_i32_108 : i32
    scf.if %223 {
      %c0_114 = arith.constant 0 : index
      %c0_115 = arith.constant 0 : index
      %232 = vector.load %arg19[%c0_114, %c0_115] : memref<32x32xf32, #tpu.memory_space<vmem>>, vector<32x32xf32>
      tpu.vector_store %arg19[%c0_114, %c0_115], %220 {strides = array<i32>} : memref<32x32xf32, #tpu.memory_space<vmem>>, vector<32x32xf32>,
    } else {
    }
    %c1_i32_109 = arith.constant 1 : i32
    %224 = arith.cmpi eq, %arg1, %c1_i32_109 : i32
    %225 = arith.extui %224 : i1 to i32
    %c0_i32_110 = arith.constant 0 : i32
    %226 = arith.cmpi ne, %225, %c0_i32_110 : i32
    scf.if %226 {
      %232 = vector.shape_cast %220 : vector<32x32xf32> to vector<2x16x32xf32>
      %c0_114 = arith.constant 0 : index
      %c0_115 = arith.constant 0 : index
      %c0_116 = arith.constant 0 : index
      %233 = vector.load %arg16[%c0_114, %c0_115, %c0_116] : memref<2x16x32xf32, #tpu.memory_space<vmem>>, vector<2x16x32xf32>
      tpu.vector_store %arg16[%c0_114, %c0_115, %c0_116], %232 {strides = array<i32>} : memref<2x16x32xf32, #tpu.memory_space<vmem>>, vector<2x16x32xf32>,
    } else {
    }
    %c2_111 = arith.constant 2 : index
    %227 = arith.index_cast %arg1 : i32 to index
    %228 = memref.load %arg2[%c2_111, %227] : memref<4x2xi32, #tpu.memory_space<smem>>
    %c1_i32_112 = arith.constant 1 : i32
    %229 = arith.cmpi eq, %228, %c1_i32_112 : i32
    %230 = arith.extui %229 : i1 to i32
    %c0_i32_113 = arith.constant 0 : i32
    %231 = arith.cmpi ne, %230, %c0_i32_113 : i32
    scf.if %231 {
      %232 = vector.shape_cast %220 : vector<32x32xf32> to vector<2x16x32xf32>
      %c0_114 = arith.constant 0 : index
      %c0_115 = arith.constant 0 : index
      %c0_116 = arith.constant 0 : index
      %c0_117 = arith.constant 0 : index
      %233 = vector.load %arg18[%c0_114, %c0_115, %c0_116, %c0_117] : memref<1x2x16x32xf32, #tpu.memory_space<vmem>>, vector<1x2x16x32xf32>
      %234 = vector.shape_cast %233 : vector<1x2x16x32xf32> to vector<2x16x32xf32>
      %235 = vector.shape_cast %232 : vector<2x16x32xf32> to vector<1x2x16x32xf32>
      tpu.vector_store %arg18[%c0_114, %c0_115, %c0_116, %c0_117], %235 {strides = array<i32>} : memref<1x2x16x32xf32, #tpu.memory_space<vmem>>, vector<1x2x16x32xf32>,
    } else {
    }
    return
  }
  func.func @transform_0(%arg0: i32, %arg1: i32, %arg2: memref<4x2xi32, #tpu.memory_space<smem>>) -> (i32, i32, i32) {
    %c0_i32 = arith.constant 0 : i32
    %c0_i32_0 = arith.constant 0 : i32
    %c0_i32_1 = arith.constant 0 : i32
    return %arg0, %c0_i32, %c0_i32_0 : i32, i32, i32
  }
  func.func @transform_1(%arg0: i32, %arg1: i32, %arg2: memref<4x2xi32, #tpu.memory_space<smem>>) -> (i32, i32, i32) {
    %c0_i32 = arith.constant 0 : i32
    %c0_i32_0 = arith.constant 0 : i32
    %c0_i32_1 = arith.constant 0 : i32
    return %arg1, %c0_i32, %c0_i32_0 : i32, i32, i32
  }
  func.func @transform_2(%arg0: i32, %arg1: i32, %arg2: memref<4x2xi32, #tpu.memory_space<smem>>) -> (i32, i32, i32) {
    %c0_i32 = arith.constant 0 : i32
    %c0_i32_0 = arith.constant 0 : i32
    %c0_i32_1 = arith.constant 0 : i32
    return %arg1, %c0_i32, %c0_i32_0 : i32, i32, i32
  }
  func.func @transform_3(%arg0: i32, %arg1: i32, %arg2: memref<4x2xi32, #tpu.memory_space<smem>>) -> (i32, i32, i32) {
    %c0_i32 = arith.constant 0 : i32
    %c0_i32_0 = arith.constant 0 : i32
    %c0_i32_1 = arith.constant 0 : i32
    return %arg1, %c0_i32, %c0_i32_0 : i32, i32, i32
  }
  func.func @transform_4(%arg0: i32, %arg1: i32, %arg2: memref<4x2xi32, #tpu.memory_space<smem>>) -> (i32, i32, i32) {
    %c0_i32 = arith.constant 0 : i32
    %c0_i32_0 = arith.constant 0 : i32
    %c0_i32_1 = arith.constant 0 : i32
    return %arg1, %c0_i32, %c0_i32_0 : i32, i32, i32
  }
  func.func @transform_5(%arg0: i32, %arg1: i32, %arg2: memref<4x2xi32, #tpu.memory_space<smem>>) -> (i32, i32, i32) {
    %c0_i32 = arith.constant 0 : i32
    %c0_i32_0 = arith.constant 0 : i32
    %c0_i32_1 = arith.constant 0 : i32
    return %arg1, %c0_i32, %c0_i32_0 : i32, i32, i32
  }
  func.func @transform_6(%arg0: i32, %arg1: i32, %arg2: memref<4x2xi32, #tpu.memory_space<smem>>) -> (i32, i32, i32) {
    %c0_i32 = arith.constant 0 : i32
    %c0_i32_0 = arith.constant 0 : i32
    %c0_i32_1 = arith.constant 0 : i32
    return %arg1, %c0_i32, %c0_i32_0 : i32, i32, i32
  }
  func.func @transform_7(%arg0: i32, %arg1: i32, %arg2: memref<4x2xi32, #tpu.memory_space<smem>>) -> (i32, i32, i32) {
    %c0_i32 = arith.constant 0 : i32
    %c0_i32_0 = arith.constant 0 : i32
    %c0_i32_1 = arith.constant 0 : i32
    return %arg1, %c0_i32, %c0_i32_0 : i32, i32, i32
  }
  func.func @transform_8(%arg0: i32, %arg1: i32, %arg2: memref<4x2xi32, #tpu.memory_space<smem>>) -> (i32, i32, i32) {
    %c0_i32 = arith.constant 0 : i32
    %c0_i32_0 = arith.constant 0 : i32
    %c0_i32_1 = arith.constant 0 : i32
    return %arg1, %c0_i32, %c0_i32_0 : i32, i32, i32
  }
  func.func @transform_9(%arg0: i32, %arg1: i32, %arg2: memref<4x2xi32, #tpu.memory_space<smem>>) -> (i32, i32, i32, i32) {
    %c0_i32 = arith.constant 0 : i32
    %c0_i32_0 = arith.constant 0 : i32
    %c0_i32_1 = arith.constant 0 : i32
    %c0_i32_2 = arith.constant 0 : i32
    return %arg1, %c0_i32, %c0_i32_0, %c0_i32_1 : i32, i32, i32, i32
  }
  func.func @transform_10(%arg0: i32, %arg1: i32, %arg2: memref<4x2xi32, #tpu.memory_space<smem>>) -> (i32, i32, i32) {
    %c0_i32 = arith.constant 0 : i32
    %c0_i32_0 = arith.constant 0 : i32
    %c0_i32_1 = arith.constant 0 : i32
    return %arg1, %c0_i32, %c0_i32_0 : i32, i32, i32
  }
  func.func @transform_11(%arg0: i32, %arg1: i32, %arg2: memref<4x2xi32, #tpu.memory_space<smem>>) -> (i32, i32, i32, i32) {
    %c0_i32 = arith.constant 0 : i32
    %c0_i32_0 = arith.constant 0 : i32
    %c0_i32_1 = arith.constant 0 : i32
    %c0_i32_2 = arith.constant 0 : i32
    return %arg1, %c0_i32, %c0_i32_0, %c0_i32_1 : i32, i32, i32, i32
  }
  func.func @transform_12(%arg0: i32, %arg1: i32, %arg2: memref<4x2xi32, #tpu.memory_space<smem>>) -> (i32, i32, i32) {
    %c0_i32 = arith.constant 0 : i32
    %c0_i32_0 = arith.constant 0 : i32
    %c0_i32_1 = arith.constant 0 : i32
    return %arg1, %c0_i32, %c0_i32_0 : i32, i32, i32
  }
  func.func @transform_13(%arg0: i32, %arg1: i32, %arg2: memref<4x2xi32, #tpu.memory_space<smem>>) -> (i32, i32, i32) {
    %c0_i32 = arith.constant 0 : i32
    %c0_i32_0 = arith.constant 0 : i32
    %c0_i32_1 = arith.constant 0 : i32
    return %arg0, %c0_i32, %c0_i32_0 : i32, i32, i32
  }
  func.func @transform_14(%arg0: i32, %arg1: i32, %arg2: memref<4x2xi32, #tpu.memory_space<smem>>) -> (i32, i32, i32, i32, i32) {
    %c1 = arith.constant 1 : index
    %0 = arith.index_cast %arg1 : i32 to index
    %1 = memref.load %arg2[%c1, %0] : memref<4x2xi32, #tpu.memory_space<smem>>
    %c0_i32 = arith.constant 0 : i32
    %c0_i32_0 = arith.constant 0 : i32
    %c0_i32_1 = arith.constant 0 : i32
    %c0_i32_2 = arith.constant 0 : i32
    return %1, %c0_i32, %arg0, %c0_i32_0, %c0_i32_1 : i32, i32, i32, i32, i32
  }
  func.func @transform_15(%arg0: i32, %arg1: i32, %arg2: memref<4x2xi32, #tpu.memory_space<smem>>) -> (i32, i32, i32, i32) {
    %c3 = arith.constant 3 : index
    %0 = arith.index_cast %arg1 : i32 to index
    %1 = memref.load %arg2[%c3, %0] : memref<4x2xi32, #tpu.memory_space<smem>>
    %c0_i32 = arith.constant 0 : i32
    %c0_i32_0 = arith.constant 0 : i32
    %c0_i32_1 = arith.constant 0 : i32
    return %1, %arg0, %c0_i32, %c0_i32_0 : i32, i32, i32, i32
  }
}

</mosaic_0001>

<bundles_post_ra>
// kernel: tpu_custom_call.1
= control target key start
LH: loop header
LB: loop body
LE: loop exit
PB: predicated region body
PF: predicated region fallthrough
CT: control target
= control target key end

     0   :  { %s4748_s0 = inlined_call_operand.vmem [shape: s32[4,2], index: 0, kind: input, shape index: {}]   ;;  %s4749_s1 = inlined_call_operand.vmem [shape: f32[2,16,32], index: 1, kind: input, shape index: {}]   ;;  %s4750_s2 = inlined_call_operand.vmem [shape: f32[2,1,32], index: 2, kind: input, shape index: {}]   ;;  %s4751_s3 = inlined_call_operand.vmem [shape: f32[2,1,32], index: 3, kind: input, shape index: {}]   ;;  %s4752_s4 = inlined_call_operand.vmem [shape: f32[2,32,96], index: 4, kind: input, shape index: {}]   ;;  %s4753_s5 = inlined_call_operand.vmem [shape: f32[2,1,96], index: 5, kind: input, shape index: {}]   ;;  %s4754_s6 = inlined_call_operand.vmem [shape: f32[2,32,32], index: 6, kind: input, shape index: {}]   ;;  %s4755_s7 = inlined_call_operand.vmem [shape: f32[2,1,32], index: 7, kind: input, shape index: {}]   ;;  %s4756_s8 = inlined_call_operand.vmem [shape: f32[2,1,32], index: 8, kind: input, shape index: {}]   ;;  %s4757_s9 = inlined_call_operand.vmem [shape: f32[2,1,32], index: 9, kind: input, shape index: {}]   ;;  %s4758_s10 = inlined_call_operand.vmem [shape: f32[2,3,32,64], index: 10, kind: input, shape index: {}]   ;;  %s4759_s11 = inlined_call_operand.vmem [shape: f32[2,1,64], index: 11, kind: input, shape index: {}]   ;;  %s4760_s12 = inlined_call_operand.vmem [shape: f32[2,3,64,32], index: 12, kind: input, shape index: {}]   ;;  %s4761_s13 = inlined_call_operand.vmem [shape: f32[2,1,32], index: 13, kind: input, shape index: {}]   ;;  %s4762_s14 = inlined_call_operand.hbm [shape: f32[2,16,32], index: 14, kind: output, shape index: {0}]   ;;  %s4763_s15 = inlined_call_operand.hbm [shape: f32[2,2,2,16,16], index: 15, kind: output, shape index: {1}]   ;;  %s4764_s16 = inlined_call_operand.hbm [shape: f32[1,2,16,32], index: 16, kind: output, shape index: {2}]  }
   0x1   :  { %4784 = sst [smem:[#allocation30_spill]] %s4748_s0 }
   0x2   :  { %4785 = sst [smem:[#allocation31_spill]] %s4749_s1 }
   0x3   :  { %4786 = sst [smem:[#allocation32_spill]] %s4752_s4 }
   0x4   :  { %4787 = sst [smem:[#allocation33_spill]] %s4754_s6 }
   0x5   :  { %4788 = sst [smem:[#allocation34_spill]] %s4756_s8 }
   0x6   :  { %4789 = sst [smem:[#allocation35_spill]] %s4757_s9 }
   0x7   :  { %4790 = sst [smem:[#allocation36_spill]] %s4758_s10 }
   0x8   :  { %4791 = sst [smem:[#allocation37_spill]] %s4759_s11 }
   0x9   :  { %4792 = sst [smem:[#allocation38_spill]] %s4760_s12 }
   0xa   :  { %4793 = sst [smem:[#allocation39_spill]] %s4761_s13 }
   0xb   :  { %4794 = sst [smem:[#allocation40_spill]] %s4762_s14 }
   0xc   :  { %4795 = sst [smem:[#allocation41_spill]] %s4763_s15 }
   0xd   :  { %4796 = sst [smem:[#allocation42_spill]] %s4764_s16 }
   0xe   :  { %s4797_s23 = sld [smem:[#allocation30_spill]] }
  0x14   :  { %s22_s1 = sshll.u32 %s4797_s23, 4  ;;  %s23_s1 = int_to_ptr.vmem [resolvable:$true] %s22_s1 }
  0x15   :  { %s3754_s24 = scalar_lea.vmem %s23_s1, 64  ;;  %p3759_p1 = scmp.lt.s32.totalorder %s23_s1, %s23_s1 }
  0x16   :  { %p3755_p0 = scmp.ne.s32.totalorder %s23_s1, %s3754_s24  ;;  %p3760_p2 = scmp.lt.s32.totalorder %s3754_s24, %s3754_s24 }
  0x18   :  { %p3761_p3 = por %p3760_p2, %p3759_p1 }
  0x1a   :  { %p3762_p4 = pnand %p3761_p3, %p3755_p0 }
  0x1c   :  { %3765 = shalt.err (!%p3762_p4)  }
  0x1d   :  { %s3928_s25 = smov [#allocation4]  }
  0x1e   :  { %25 = dma.vmem_to_smem %s23_s1, 64, %s3928_s25, [#allocation3] }
  0x1f   :  { %3878 = dma.done.wait [#allocation3], 64 }
  0x20   :  { %3879 = vsyncadd [#allocation3], 4294967232 }
  0x21   :  { %27 = sfence }
  0x22   :  { %28 = vsyncpa [#allocation6], 0 }
  0x23   :  { %29 = vsyncpa [#allocation8], 0 }
  0x24   :  { %31 = vsyncpa [#allocation8 + $0x1], 0  ;;  %s4028_s26 = smov 0   ;;  %s4030_s27 = smov 0  }
  0x25   :  { %s4032_s28 = smov 0   ;;  %s4034_s29 = smov 0  }
  0x26   :  { %s4036_s30 = smov 0   ;;  %s4038_s0 = smov 0  }
  0x27   :  { %s4040_s17 = smov 0   ;;  %s4042_s1 = smov 0  }
  0x28   :  { %s4044_s18 = smov 0  }
  0x29 LB: > { %4798 = sst [smem:[#allocation16_spill]] %s3898_s27  ;;  %s46_s20 = sadd.s32 1, %s3922_s1  ;;  %s3926_s18 = sphi %s4044_s18, %s37_s18   ;;  %s3922_s1 = sphi %s4042_s1, %s4860_s1   ;;  %s3918_s17 = sphi %s4040_s17, %s4859_s17   ;;  %s3914_s0 = sphi %s4038_s0, %s4858_s0   ;;  %s3910_s30 = sphi %s4036_s30, %s4857_s30   ;;  %s3906_s29 = sphi %s4034_s29, %s4856_s29   ;;  %s3902_s28 = sphi %s4032_s28, %s4855_s28   ;;  %s3898_s27 = sphi %s4030_s27, %s4854_s27   ;;  %s3894_s26 = sphi %s4028_s26, %s4853_s26  }
  0x2a   : > { %4799 = sst [smem:[#allocation17_spill]] %s3902_s28  ;;  %s417_s21 = sshra.s32 %s3922_s1, 7 }
  0x2b   : > { %4800 = sst [smem:[#allocation18_spill]] %s3910_s30  ;;  %p47_p5 = scmp.ge.s32.totalorder %s46_s20, 2 }
  0x2c   : > { %4801 = sst [smem:[#allocation19_spill]] %s3914_s0  ;;  %s3282_s22 = sshll.u32 %s417_s21, 7 }
  0x2d   : > { %4802 = sst [smem:[#allocation20_spill]] %s3922_s1  ;;  %s3283_s23 = sadd.s32 128, %s3282_s22 }
  0x2e   : > { %4803 = sst [smem:[#allocation21_spill]] %s3926_s18  ;;  %s422_s24 = sand.u32 127, %s3922_s1 }
  0x2f   : > { %s4862_s20 = smov (%p47_p5, %s46_s20), 0  ;;  %s423_s16 = sadd.s32 %s3283_s23, %s422_s24 }
  0x30   : > { %4804 = sst [smem:[#allocation22_spill]] %s4862_s20  ;;  %s425_s14 = sshra.s32 %s4862_s20, 7 }
  0x31   : > { %s424_s15 = sld [smem:[#allocation4 + %s423_s16]]  ;;  %s3284_s12 = sshll.u32 %s425_s14, 7 }
  0x32   : > { %s430_s19 = sand.u32 127, %s4862_s20  ;;  %s3285_s13 = sadd.s32 128, %s3284_s12 }
  0x33   : > { %p448_p6 = scmp.ne.s32.totalorder %s3914_s0, %s3910_s30  ;;  %s431_s10 = sadd.s32 %s3285_s13, %s430_s19 }
  0x34   : > { %s4805_s21 = sadd.s32 4294967295, %s3926_s18   ;;  %s432_s25 = sld [smem:[#allocation4 + %s431_s10]] }
  0x35   : > { %p4086_p7 = scmp.eq.s32.totalorder %s4805_s21, 1  ;;  %p454_p8 = scmp.ne.s32.totalorder %s3910_s30, %s3906_s29 }
  0x36   : > { %s4810_s16 = sadd.s32 4294967294, %s3926_s18   ;;  %s3287_s23 = sadd.s32 384, %s3282_s22 }
  0x37   : > { %s4806_s11 = scalar_select %p4086_p7, 1, 0 }
  0x38   : > { %p4094_p9 = por %p4086_p7, %p448_p6  ;;  %p4100_p10 = scmp.eq.s32.totalorder %s4810_s16, 1 }
  0x39   : > { %4807 = sst [smem:[#allocation23_spill]] %s4806_s11  ;;  %s3289_s21 = sadd.s32 384, %s3284_s12 }
  0x3a   : > { %s4808_s14 = scalar_select %p4094_p9, 1, 0 }
  0x3b   : > { %p4106_p11 = por %p4100_p10, %p454_p8  ;;  %s467_s29 = sadd.s32 %s3287_s23, %s422_s24 }
  0x3c   : > { %4809 = sst [smem:[#allocation24_spill]] %s4808_s14  ;;  %s475_s1 = sadd.s32 %s3289_s21, %s430_s19 }
  0x3d   : > { %s4812_s10 = scalar_select %p4106_p11, 1, 0 }
  0x3e   : > { %s468_s20 = sld [smem:[#allocation4 + %s467_s29]]  ;;  %s438_s14 = sadd.s32 1, %s3914_s0 }
  0x3f   : > { %4813 = sst [smem:[#allocation25_spill]] %s4812_s10  ;;  %s433_s9 = ssub.s32 %s424_s15, %s432_s25 }
  0x40   : > { %s476_s16 = sld [smem:[#allocation4 + %s475_s1]]  ;;  %p492_p12 = scmp.ne.s32.totalorder %s3902_s28, %s3898_s27 }
  0x41   : > { %p436_p13 = scmp.eq.s32.totalorder %s433_s9, 0  ;;  %p498_p0 = scmp.ne.s32.totalorder %s3898_s27, %s3894_s26 }
  0x42   : > { %p4117_p1 = por %p492_p12, %p4086_p7  ;;  %p3162_p2 = scmp.ge.s32.totalorder %s3926_s18, 1 }
  0x43   : > { %s4123_s12 = scalar_select %p436_p13, %s3914_s0, %s438_s14  }
  0x44   : > { %s4814_s22 = scalar_select %p4117_p1, 1, 0 }
  0x45   : > { %4816 = sst [smem:[#allocation27_spill]] %s4123_s12  ;;  %p4127_p3 = por %p498_p0, %p4100_p10 }
  0x46   : > { %4815 = sst [smem:[#allocation26_spill]] %s4814_s22  ;;  %p607_p4 = scmp.lt.s32.totalorder %s3926_s18, 3 }
  0x47   : > { %s4817_s24 = scalar_select %p4127_p3, 1, 0 }
  0x48   : > { %s477_s19 = ssub.s32 %s468_s20, %s476_s16  ;;  %s482_s1 = sadd.s32 1, %s3902_s28 }
  0x49   : > { %4818 = sst [smem:[#allocation28_spill]] %s4817_s24  ;;  %p480_p5 = scmp.eq.s32.totalorder %s477_s19, 0 }
  0x4a   : > { %p608_p6 = pnand %p3162_p2, %p607_p4 }
  0x4b   : > { %s4134_s9 = scalar_select %p480_p5, %s3902_s28, %s482_s1  }
  0x4c   : > { %611 = sbr.rel (%p608_p6) target bundleno = 3393 (0xd41), region = 72  ;;  %s695_s15 = sand.u32 (!%p608_p6), 1, %s3910_s30  }
  0x4d   : > { %4819 = sst [smem:[#allocation29_spill]] %s4134_s9  ;;  %s702_s26 = sand.u32 (!%p608_p6), 1, %s3898_s27  }
  0x4e   : > { %s3163_s25 = sshll.u32 (!%p608_p6), %s695_s15, 6  ;;  %s3164_s14 = sshll.u32 (!%p608_p6), %s702_s26, 5 }
  0x4f   : > { %p712_p8 = scmp.lt.s32.totalorder (!%p608_p6), %s3918_s17, 1  ;;  %s4820_s4 = sld [smem:[#allocation32_spill]] (!%p608_p6) }
  0x50   : > { %s4821_s6 = sld [smem:[#allocation33_spill]] (!%p608_p6)  ;;  %s4199_s26 = scalar_lea.vmem (!%p608_p6), [#allocation9], %s3164_s14 }
  0x51   : > { %s4140_s13 = scalar_select %p712_p8, %s3918_s17, 1 }
  0x52   : > { %s4823_s23 = sld [smem:[#allocation35_spill]]  ;;  %p3171_p10 = scmp.ne.s32.totalorder %s3918_s17, 0 }
  0x53   : > { %s3290_s1 = sshll.u32 %s4140_s13, 5  ;;  %s3600_s12 = smul.u32 96, %s4140_s13 }
  0x54   : > { %s4824_s22 = sld [smem:[#allocation37_spill]]  ;;  %s3601_s30 = smul.u32 192, %s4140_s13 }
  0x55   : > { %s4158_s0 = scalar_lea.vmem %s4820_s4, %s3290_s1  ;;  %s4826_s29 = sld [smem:[#allocation39_spill]] }
  0x56   : > { %s4163_s28 = scalar_lea.vmem %s4821_s6, %s3290_s1  ;;  %s4825_s6 = sld [smem:[#allocation36_spill]] }
  0x57   : > { %s4827_s8 = sld [smem:[#allocation38_spill]] }
  0x58   : > { %s739_s10 = scalar_lea.vmem %s4823_s23, %s4140_s13  ;;  %s4197_s23 = scalar_lea.vmem [#allocation7], %s3163_s25 }
  0x59   : > { %778 = sbr.rel (%p3171_p10) target bundleno = 101 (0x65), region = 76 }
  0x5a   : > { %s747_s11 = scalar_lea.vmem %s4824_s22, %s4140_s13 }
  0x5b   : > { %s755_s19 = scalar_lea.vmem %s4826_s29, %s4140_s13 }
  0x5c   : > { %s4186_s18 = scalar_lea.vmem %s4825_s6, %s3600_s12  ;;  %s4828_s6 = sld [smem:[#allocation31_spill]] (!%p3171_p10) }
  0x5d   : > { %s4195_s15 = scalar_lea.vmem %s4827_s8, %s3601_s30 }
  0x5e   : > { %vm783_vm0 = vcmask 261120  }
  0x62   : > { %v779_v0 = vld [vmem:[%s4828_s6] sm:$0xff]  ;;  %v780_v1 = vld [vmem:[%s4828_s6 + $0x8] sm:$0xff]  ;;  %v781_v2 = vld [vmem:[%s4828_s6 + $0x10] sm:$0xff] }
  0x63   : > { %784 = vst.msk [vmem:[#allocation2] sm:$0xff] %vm783_vm0, %v779_v0  ;;  %785 = vst.msk [vmem:[#allocation2 + $0x8] sm:$0xff] %vm783_vm0, %v780_v1  ;;  %v782_v3 = vld [vmem:[%s4828_s6 + $0x18] sm:$0xff] }
  0x64   : > { %786 = vst.msk [vmem:[#allocation2 + $0x10] sm:$0xff] %vm783_vm0, %v781_v2  ;;  %787 = vst.msk [vmem:[#allocation2 + $0x18] sm:$0xff] %vm783_vm0, %v782_v3 }
  0x65 PF: > { %vm794_vm1 = vcmask 261120   ;;  %v871_v32 = vld [vmem:[%s4158_s0 + $0x18] sm:$0xff]  ;;  %v870_v33 = vld [vmem:[%s4158_s0 + $0x10] sm:$0xff]  ;;  %v869_v34 = vld [vmem:[%s4158_s0 + $0x8] sm:$0xff]  ;;  %s4829_s30 = scalar_lea.vmem %s4750_s2, %s4140_s13  ;;  %s4830_s27 = scalar_lea.vmem %s4751_s3, %s4140_s13  ;;  %vm983_vm2 = vcmask 130048  }
  0x66   : > { %3408 = vmatprep.subr.mxu1 %v871_v32  ;;  %v868_v35 = vld [vmem:[%s4158_s0] sm:$0xff]  ;;  %s4257_s21 = sld [smem:[#allocation4 + %s3918_s17]]  ;;  %s4831_s22 = scalar_lea.vmem %s4753_s5, %s4140_s13 }
  0x67   : > { %3409 = vmatpush3.msra.mxu1 %v871_v32  ;;  %v3172_v49 = vld [vmem:[%s4829_s30] ss:$0 sm:$0xff]  ;;  %s3929_s12 = smov 96  }
  0x68   : > { %3410 = vmatprep.subr.mxu1 %v870_v33  ;;  %v3173_v51 = vld [vmem:[%s4830_s27] ss:$0 sm:$0xff] }
  0x69   : > { %3411 = vmatpush3.msra.mxu1 %v870_v33  ;;  %v3174_v2 = vld [vmem:[%s4831_s22] ss:$0 sm:$0xff] }
  0x6a   : > { %v4214_v4 = vld [vmem:[#allocation2] sm:$0xff]  ;;  %v4218_v6 = vld [vmem:[#allocation2 + $0x8] sm:$0xff]  ;;  %3412 = vmatprep.subr.mxu1 %v869_v34 }
  0x6b   : > { %v4216_v5 = vld [vmem:[#allocation2 + $0x10] sm:$0xff]  ;;  %v795_v7 = vsel %vm794_vm1, %v4214_v4, 0.0  ;;  %v4224_v9 = vld [vmem:[#allocation2 + $0x18] sm:$0xff]  ;;  %v798_v10 = vsel %vm794_vm1, %v4218_v6, 0.0  ;;  %3413 = vmatpush3.msra.mxu1 %v869_v34 }
  0x6c   : > { %v801_v8 = vsel %vm794_vm1, %v4216_v5, 0.0  ;;  %796 = vadd.xlane.f32.xlu0 %v795_v7  ;;  %v804_v11 = vsel %vm794_vm1, %v4224_v9, 0.0  ;;  %3414 = vmatprep.subr.mxu1 %v868_v35  ;;  %p3187_p12 = scmp.ne.s32.totalorder %s4257_s21, 1 }
  0x6d   : > { %802 = vadd.xlane.f32.xlu1 %v801_v8  ;;  %3415 = vmatpush3.msra.mxu1 %v868_v35 }
  0x70   : > { %799 = vadd.xlane.f32.xlu0 %v798_v10 }
  0x71   : > { %805 = vadd.xlane.f32.xlu1 %v804_v11 }
  0xf5   : > { %v797_v12 = vpop.xlane.xlu0 %796 }
  0xf6   : > { %v803_v13 = vpop.xlane.xlu1 %802  ;;  %v808_v14 = vmul.f32 0.03125, %v797_v12 }
  0xf7   : > { %v810_v15 = vmul.f32 0.03125, %v803_v13 }
  0xf8   : > { %v812_v16 = vsub.f32 %v4214_v4, %v808_v14 }
  0xf9   : > { %v814_v17 = vsub.f32 %v4216_v5, %v810_v15  ;;  %v800_v18 = vpop.xlane.xlu0 %799 }
  0xfa   : > { %v806_v19 = vpop.xlane.xlu1 %805  ;;  %v809_v20 = vmul.f32 0.03125, %v800_v18  ;;  %v816_v22 = vmul.f32 %v812_v16, %v812_v16 }
  0xfb   : > { %v811_v21 = vmul.f32 0.03125, %v806_v19  ;;  %v818_v23 = vmul.f32 %v814_v17, %v814_v17 }
  0xfc   : > { %v813_v24 = vsub.f32 %v4218_v6, %v809_v20  ;;  %v820_v26 = vsel %vm794_vm1, %v816_v22, 0.0 }
  0xfd   : > { %v815_v25 = vsub.f32 %v4224_v9, %v811_v21  ;;  %821 = vadd.xlane.f32.xlu0 %v820_v26  ;;  %v826_v27 = vsel %vm794_vm1, %v818_v23, 0.0 }
  0xfe   : > { %v817_v28 = vmul.f32 %v813_v24, %v813_v24 }
  0xff   : > { %v819_v29 = vmul.f32 %v815_v25, %v815_v25 }
 0x100   : > { %v823_v30 = vsel %vm794_vm1, %v817_v28, 0.0 }
 0x101   : > { %827 = vadd.xlane.f32.xlu0 %v826_v27  ;;  %824 = vadd.xlane.f32.xlu1 %v823_v30  ;;  %v829_v31 = vsel %vm794_vm1, %v819_v29, 0.0 }
 0x105   : > { %830 = vadd.xlane.f32.xlu1 %v829_v31 }
 0x186   : > { %v822_v36 = vpop.xlane.xlu0 %821 }
 0x187   : > { %v832_v37 = vmul.f32 0.03125, %v822_v36 }
 0x189   : > { %v836_v38 = vadd.f32 1e-05, %v832_v37 }
 0x18a   : > { %v825_v39 = vpop.xlane.xlu1 %824  ;;  %v828_v40 = vpop.xlane.xlu0 %827 }
 0x18b   : > { %3706 = vrsqrt.f32 %v836_v38  ;;  %v833_v41 = vmul.f32 0.03125, %v825_v39  ;;  %v834_v42 = vmul.f32 0.03125, %v828_v40 }
 0x18d   : > { %v837_v43 = vadd.f32 1e-05, %v833_v41  ;;  %v838_v44 = vadd.f32 1e-05, %v834_v42 }
 0x18e   : > { %v831_v45 = vpop.xlane.xlu1 %830 }
 0x18f   : > { %3708 = vrsqrt.f32 %v837_v43  ;;  %v835_v46 = vmul.f32 0.03125, %v831_v45 }
 0x190   : > { %3710 = vrsqrt.f32 %v838_v44 }
 0x191   : > { %v839_v47 = vadd.f32 1e-05, %v835_v46 }
 0x193   : > { %3712 = vrsqrt.f32 %v839_v47 }
 0x198   : > { %v3707_v48 = vpop.eup %3706 }
 0x199   : > { %v844_v50 = vmul.f32 %v3707_v48, %v812_v16 }
 0x19b   : > { %v854_v52 = vmul.f32 %v3172_v49, %v844_v50 }
 0x19c   : > { %v3709_v53 = vpop.eup %3708 }
 0x19d   : > { %v3711_v54 = vpop.eup %3710  ;;  %v864_v55 = vadd.f32 %v3173_v51, %v854_v52  ;;  %v845_v56 = vmul.f32 %v3709_v53, %v813_v24 }
 0x19e   : > { %v846_v57 = vmul.f32 %v3711_v54, %v814_v17 }
 0x19f   : > { %3416 = vmatprep.mubr.msk.f32.mxu1 %vm794_vm1, %v864_v55  ;;  %v855_v58 = vmul.f32 %v3172_v49, %v845_v56 }
 0x1a0   : > { %v3713_v59 = vpop.eup %3712  ;;  %v856_v60 = vmul.f32 %v3172_v49, %v846_v57 }
 0x1a1   : > { %v865_v61 = vadd.f32 %v3173_v51, %v855_v58  ;;  %v847_v62 = vmul.f32 %v3713_v59, %v815_v25 }
 0x1a2   : > { %v866_v63 = vadd.f32 %v3173_v51, %v856_v60 }
 0x1a3   : > { %3417 = vmatmul.mubr.msk.f32.vlgmr.msra.gmra.mxu1 %vm794_vm1, %v865_v61  ;;  %v857_v0 = vmul.f32 %v3172_v49, %v847_v62 }
 0x1a4   : > { %3419 = vmatprep.mubr.msk.f32.mxu1 %vm794_vm1, %v866_v63 }
 0x1a5   : > { %v867_v1 = vadd.f32 %v3173_v51, %v857_v0 }
 0x1a7   : > { %3420 = vmatmul.mubr.msk.f32.gmra.mxu1 %vm794_vm1, %v867_v1 }
 0x263   : > { %v3418_v3 = vpop.f32.mrf.mxu1 }
 0x264   : > { %v4264_v7 = vadd.f32 %v3418_v3, %v3174_v2 }
 0x265   : > { %v957_v8 = vpop.f32.mrf.mxu1 }
 0x266   : > { %v4266_v10 = vadd.f32 %v3174_v2, %v957_v8  ;;  %981 = vrot.lane.b32.xlu0 %v4264_v7, %s3929_s12 }
 0x267   : > { %v3421_v11 = vpop.f32.mrf.mxu1 }
 0x268   : > { %979 = vrot.lane.b32.xlu1 %v4266_v10, %s3929_s12  ;;  %3426 = vmatprep.mubr.msk.f32.mxu1 %vm983_vm2, %v4266_v10  ;;  %v4272_v13 = vadd.f32 %v3421_v11, %v3174_v2 }
 0x269   : > { %v967_v12 = vpop.f32.mrf.mxu1 }
 0x26a   : > { %v4274_v14 = vadd.f32 %v3174_v2, %v967_v12 }
 0x26c   : > { %1071 = vrot.lane.b32.xlu1 %v4272_v13, %s3929_s12  ;;  %3433 = vmatprep.mubr.msk.f32.mxu0 %vm983_vm2, %v4274_v14 }
 0x270   : > { %1069 = vrot.lane.b32.xlu1 %v4274_v14, %s3929_s12 }
 0x2d8   : > { %v982_v15 = vpop.permute.xlu0 %981 }
 0x2d9   : > { %3422 = vmatprep.subr.msk.mxu1 %vm983_vm2, %v982_v15 }
 0x2da   : > { %v980_v16 = vpop.permute.xlu1 %979  ;;  %3423 = vmatpush3.xpose.msk.msra.mxu1 %vm983_vm2, %v982_v15 }
 0x2db   : > { %3424 = vmatprep.subr.msk.mxu1 %vm983_vm2, %v980_v16 }
 0x2de   : > { %v1072_v17 = vpop.permute.xlu1 %1071  ;;  %3425 = vmatpush3.xpose.msk.msra.mxu1 %vm983_vm2, %v980_v16 }
 0x2df   : > { %3429 = vmatprep.subr.msk.mxu0 %vm983_vm2, %v1072_v17 }
 0x2e0   : > { %3430 = vmatpush3.xpose.msk.msra.mxu0 %vm983_vm2, %v1072_v17 }
 0x2e1   : > { %3427 = vmatmul.mubr.msk.f32.vlgmr.msra.gmra.mxu1 %vm983_vm2, %v4264_v7 }
 0x2e2   : > { %v1070_v18 = vpop.permute.xlu1 %1069 }
 0x2e3   : > { %3431 = vmatprep.subr.msk.mxu0 %vm983_vm2, %v1070_v18 }
 0x2e4   : > { %3432 = vmatpush3.xpose.msk.msra.mxu0 %vm983_vm2, %v1070_v18 }
 0x2e7   : > { %3434 = vmatmul.mubr.msk.f32.vlgmr.msra.gmra.mxu0 %vm983_vm2, %v4272_v13 }
 0x3a1   : > { %v3428_v19 = vpop.f32.mrf.mxu1 }
 0x3a2   : > { %v1157_v20 = vmul.f32 0.25, %v3428_v19 }
 0x3a3   : > { %v1058_v21 = vpop.f32.mrf.mxu1 }
 0x3a4   : > { %v1156_v22 = vmul.f32 0.25, %v1058_v21  ;;  %v1163_v23 = vsel %vm983_vm2, %v1157_v20, -inf }
 0x3a5   : > { %1164 = vmax.xlane.f32.xlu1 %v1163_v23 }
 0x3a6   : > { %v1160_v24 = vsel %vm983_vm2, %v1156_v22, -inf }
 0x3a7   : > { %v3435_v25 = vpop.f32.mrf.mxu0  ;;  %1161 = vmax.xlane.f32.xlu0 %v1160_v24 }
 0x3a8   : > { %v1159_v28 = vmul.f32 0.25, %v3435_v25 }
 0x3a9   : > { %v1147_v26 = vpop.f32.mrf.mxu0 }
 0x3aa   : > { %v1158_v27 = vmul.f32 0.25, %v1147_v26  ;;  %v1169_v30 = vsel %vm983_vm2, %v1159_v28, -inf }
 0x3ac   : > { %v1166_v29 = vsel %vm983_vm2, %v1158_v27, -inf }
 0x3ad   : > { %1167 = vmax.xlane.f32.xlu0 %v1166_v29 }
 0x3b1   : > { %1170 = vmax.xlane.f32.xlu0 %v1169_v30 }
 0x42e   : > { %v1165_v31 = vpop.xlane.xlu1 %1164 }
 0x42f   : > { %v1173_v32 = vsub.f32 %v1157_v20, %v1165_v31 }
 0x430   : > { %v1162_v33 = vpop.xlane.xlu0 %1161 }
 0x431   : > { %v1178_v34 = vmul.f32 1.442695, %v1173_v32  ;;  %v1172_v35 = vsub.f32 %v1156_v22, %v1162_v33 }
 0x433   : > { %3714 = vpow2.f32 %v1178_v34  ;;  %v1176_v36 = vmul.f32 1.442695, %v1172_v35 }
 0x435   : > { %3716 = vpow2.f32 %v1176_v36 }
 0x436   : > { %v1168_v37 = vpop.xlane.xlu0 %1167 }
 0x437   : > { %v1174_v38 = vsub.f32 %v1158_v27, %v1168_v37 }
 0x439   : > { %v1180_v39 = vmul.f32 1.442695, %v1174_v38 }
 0x43a   : > { %v1171_v40 = vpop.xlane.xlu0 %1170 }
 0x43b   : > { %3718 = vpow2.f32 %v1180_v39  ;;  %v1175_v41 = vsub.f32 %v1159_v28, %v1171_v40 }
 0x43d   : > { %v1182_v42 = vmul.f32 1.442695, %v1175_v41 }
 0x43f   : > { %3720 = vpow2.f32 %v1182_v42 }
 0x440   : > { %v3715_v43 = vpop.eup %3714 }
 0x441   : > { %v1187_v44 = vsel %vm983_vm2, %v3715_v43, 0.0 }
 0x442   : > { %v3717_v45 = vpop.eup %3716  ;;  %1188 = vadd.xlane.f32.xlu1 %v1187_v44 }
 0x443   : > { %v1184_v46 = vsel %vm983_vm2, %v3717_v45, 0.0 }
 0x444   : > { %1185 = vadd.xlane.f32.xlu0 %v1184_v46 }
 0x448   : > { %v3719_v47 = vpop.eup %3718 }
 0x449   : > { %v1190_v48 = vsel %vm983_vm2, %v3719_v47, 0.0 }
 0x44a   : > { %1191 = vadd.xlane.f32.xlu0 %v1190_v48 }
 0x44c   : > { %v3721_v49 = vpop.eup %3720 }
 0x44d   : > { %v1193_v50 = vsel %vm983_vm2, %v3721_v49, 0.0 }
 0x44e   : > { %1194 = vadd.xlane.f32.xlu1 %v1193_v50 }
 0x4cb   : > { %v1189_v51 = vpop.xlane.xlu1 %1188 }
 0x4cc   : > { %3722 = vrcp.f32 %v1189_v51 }
 0x4cd   : > { %v1186_v52 = vpop.xlane.xlu0 %1185 }
 0x4ce   : > { %3724 = vrcp.f32 %v1186_v52 }
 0x4d3   : > { %v1192_v53 = vpop.xlane.xlu0 %1191 }
 0x4d4   : > { %3726 = vrcp.f32 %v1192_v53 }
 0x4d7   : > { %v1195_v54 = vpop.xlane.xlu1 %1194 }
 0x4d8   : > { %3728 = vrcp.f32 %v1195_v54 }
 0x4d9   : > { %v3723_v55 = vpop.eup %3722 }
 0x4da   : > { %v1201_v56 = vmul.f32 %v3723_v55, %v3715_v43 }
 0x4db   : > { %v3725_v57 = vpop.eup %3724 }
 0x4dc   : > { %v1200_v58 = vmul.f32 %v3725_v57, %v3717_v45 }
 0x4e1   : > { %v3727_v59 = vpop.eup %3726 }
 0x4e2   : > { %v1202_v60 = vmul.f32 %v3727_v59, %v3719_v47  ;;  %1207 = sbr.rel (%p3187_p12) target bundleno = 1257 (0x4e9), region = 80 }
 0x4e5   : > { %v3729_v61 = vpop.eup %3728 }
 0x4e6   : > { %v1203_v62 = vmul.f32 %v3729_v61, %v3721_v49 }
 0x4e7   : > { %1208 = vst.msk [vmem:[%s4197_s23] sm:$0xff] %vm983_vm2, %v1200_v58  ;;  %1209 = vst.msk [vmem:[%s4197_s23 + $0x8] sm:$0xff] %vm983_vm2, %v1201_v56 }
 0x4e8   : > { %1210 = vst.msk [vmem:[%s4197_s23 + $0x10] sm:$0xff] %vm983_vm2, %v1202_v60  ;;  %1211 = vst.msk [vmem:[%s4197_s23 + $0x18] sm:$0xff] %vm983_vm2, %v1203_v62 }
 0x4e9 PF: > { %3440 = vmatprep.mubr.msk.f32.mxu1 %vm983_vm2, %v1200_v58  ;;  %s3930_s20 = smov 64   ;;  %s3931_s29 = smov 80  }
 0x4ea   : > { %1214 = vrot.lane.b32.xlu0 %v4264_v7, %s3930_s20  ;;  %1301 = vrot.lane.b32.xlu1 %v4272_v13, %s3930_s20  ;;  %s3932_s24 = smov 112  }
 0x4ee   : > { %1212 = vrot.lane.b32.xlu0 %v4266_v10, %s3930_s20  ;;  %1299 = vrot.lane.b32.xlu1 %v4274_v14, %s3930_s20 }
 0x4f2   : > { %1392 = vrot.lane.b32.xlu0 %v4264_v7, %s3931_s29  ;;  %1483 = vrot.lane.b32.xlu1 %v4272_v13, %s3931_s29 }
 0x4f6   : > { %1390 = vrot.lane.b32.xlu0 %v4266_v10, %s3931_s29  ;;  %1481 = vrot.lane.b32.xlu1 %v4274_v14, %s3931_s29 }
 0x4fa   : > { %1386 = vrot.lane.b32.xlu0 %v4266_v10, %s3932_s24  ;;  %1477 = vrot.lane.b32.xlu1 %v4274_v14, %s3932_s24 }
 0x4fe   : > { %1388 = vrot.lane.b32.xlu0 %v4264_v7, %s3932_s24  ;;  %1479 = vrot.lane.b32.xlu1 %v4272_v13, %s3932_s24 }
 0x55c   : > { %v1215_v63 = vpop.permute.xlu0 %1214  ;;  %v1302_v0 = vpop.permute.xlu1 %1301 }
 0x55d   : > { %3436 = vmatprep.subr.mxu1 %v1215_v63 }
 0x55e   : > { %3437 = vmatpush3.msra.mxu1 %v1215_v63 }
 0x560   : > { %v1213_v1 = vpop.permute.xlu0 %1212  ;;  %v1300_v2 = vpop.permute.xlu1 %1299 }
 0x561   : > { %3438 = vmatprep.subr.mxu1 %v1213_v1 }
 0x562   : > { %3439 = vmatpush3.msra.mxu1 %v1213_v1 }
 0x563   : > { %3443 = vmatprep.subr.mxu1 %v1302_v0  ;;  %3441 = vmatmul.mubr.msk.f32.vlgmr.msra.gmra.mxu1 %vm983_vm2, %v1201_v56 }
 0x564   : > { %3444 = vmatpush3.msra.mxu1 %v1302_v0  ;;  %v1393_v3 = vpop.permute.xlu0 %1392  ;;  %v1484_v8 = vpop.permute.xlu1 %1483  ;;  %3447 = vmatprep.mubr.msk.f32.mxu1 %vm983_vm2, %v1202_v60 }
 0x565   : > { %3445 = vmatprep.subr.mxu1 %v1300_v2  ;;  %3450 = vmatprep.subr.msk.mxu0 %vm983_vm2, %v1393_v3 }
 0x566   : > { %3446 = vmatpush3.msra.mxu1 %v1300_v2  ;;  %3451 = vmatpush3.xpose.msk.msra.mxu0 %vm983_vm2, %v1393_v3 }
 0x567   : > { %3457 = vmatprep.subr.msk.mxu1 %vm983_vm2, %v1484_v8  ;;  %3448 = vmatmul.mubr.msk.f32.vlgmr.msra.gmra.mxu1 %vm983_vm2, %v1203_v62 }
 0x568   : > { %v1391_v11 = vpop.permute.xlu0 %1390  ;;  %3458 = vmatpush3.xpose.msk.msra.mxu1 %vm983_vm2, %v1484_v8  ;;  %v1482_v12 = vpop.permute.xlu1 %1481 }
 0x569   : > { %3452 = vmatprep.subr.msk.mxu0 %vm983_vm2, %v1391_v11  ;;  %3459 = vmatprep.subr.msk.mxu1 %vm983_vm2, %v1482_v12 }
 0x56a   : > { %3453 = vmatpush3.xpose.msk.msra.mxu0 %vm983_vm2, %v1391_v11 }
 0x56c   : > { %v1387_v15 = vpop.permute.xlu0 %1386  ;;  %3460 = vmatpush3.xpose.msk.msra.mxu1 %vm983_vm2, %v1482_v12  ;;  %v1478_v16 = vpop.permute.xlu1 %1477 }
 0x56d   : > { %3454 = vmatprep.mubr.msk.f32.mxu0 %vm983_vm2, %v1387_v15  ;;  %3461 = vmatprep.mubr.msk.f32.mxu1 %vm983_vm2, %v1478_v16 }
 0x570   : > { %v1389_v17 = vpop.permute.xlu0 %1388  ;;  %v1480_v18 = vpop.permute.xlu1 %1479 }
 0x571   : > { %3455 = vmatmul.mubr.msk.f32.vlgmr.msra.gmra.mxu0 %vm983_vm2, %v1389_v17  ;;  %3462 = vmatmul.mubr.msk.f32.vlgmr.msra.gmra.mxu1 %vm983_vm2, %v1480_v18 }
 0x623   : > { %v4339_v19 = vpop.f32.mrf.mxu1 }
 0x625   : > { %v4341_v20 = vpop.f32.mrf.mxu1 }
 0x627   : > { %v4343_v21 = vpop.f32.mrf.mxu1 }
 0x629   : > { %v4345_v22 = vpop.f32.mrf.mxu1 }
 0x631   : > { %v3456_v23 = vpop.f32.mrf.mxu0  ;;  %v3463_v24 = vpop.f32.mrf.mxu1 }
 0x632   : > { %v1569_v25 = vmul.f32 0.25, %v3456_v23  ;;  %v1571_v32 = vmul.f32 0.25, %v3463_v24 }
 0x633   : > { %v1468_v26 = vpop.f32.mrf.mxu0  ;;  %v1559_v27 = vpop.f32.mrf.mxu1 }
 0x634   : > { %v1568_v28 = vmul.f32 0.25, %v1468_v26  ;;  %v1575_v29 = vsel %vm983_vm2, %v1569_v25, -inf  ;;  %v1570_v30 = vmul.f32 0.25, %v1559_v27  ;;  %v1581_v34 = vsel %vm983_vm2, %v1571_v32, -inf }
 0x635   : > { %1576 = vmax.xlane.f32.xlu1 %v1575_v29 }
 0x636   : > { %v1572_v31 = vsel %vm983_vm2, %v1568_v28, -inf  ;;  %v1578_v33 = vsel %vm983_vm2, %v1570_v30, -inf }
 0x637   : > { %1573 = vmax.xlane.f32.xlu0 %v1572_v31 }
 0x63b   : > { %1579 = vmax.xlane.f32.xlu0 %v1578_v33 }
 0x63f   : > { %1582 = vmax.xlane.f32.xlu0 %v1581_v34 }
 0x6be   : > { %v1577_v35 = vpop.xlane.xlu1 %1576 }
 0x6bf   : > { %v1585_v36 = vsub.f32 %v1569_v25, %v1577_v35 }
 0x6c0   : > { %v1574_v37 = vpop.xlane.xlu0 %1573 }
 0x6c1   : > { %v1590_v38 = vmul.f32 1.442695, %v1585_v36  ;;  %v1584_v39 = vsub.f32 %v1568_v28, %v1574_v37 }
 0x6c3   : > { %3730 = vpow2.f32 %v1590_v38  ;;  %v1588_v40 = vmul.f32 1.442695, %v1584_v39 }
 0x6c4   : > { %v1580_v41 = vpop.xlane.xlu0 %1579 }
 0x6c5   : > { %3732 = vpow2.f32 %v1588_v40  ;;  %v1586_v42 = vsub.f32 %v1570_v30, %v1580_v41 }
 0x6c7   : > { %v1592_v43 = vmul.f32 1.442695, %v1586_v42 }
 0x6c8   : > { %v1583_v44 = vpop.xlane.xlu0 %1582 }
 0x6c9   : > { %3734 = vpow2.f32 %v1592_v43  ;;  %v1587_v45 = vsub.f32 %v1571_v32, %v1583_v44 }
 0x6cb   : > { %v1594_v46 = vmul.f32 1.442695, %v1587_v45 }
 0x6cd   : > { %3736 = vpow2.f32 %v1594_v46 }
 0x6d0   : > { %v3731_v47 = vpop.eup %3730 }
 0x6d1   : > { %v1599_v48 = vsel %vm983_vm2, %v3731_v47, 0.0 }
 0x6d2   : > { %v3733_v49 = vpop.eup %3732  ;;  %1600 = vadd.xlane.f32.xlu0 %v1599_v48 }
 0x6d3   : > { %v1596_v50 = vsel %vm983_vm2, %v3733_v49, 0.0 }
 0x6d4   : > { %1597 = vadd.xlane.f32.xlu1 %v1596_v50 }
 0x6d6   : > { %v3735_v51 = vpop.eup %3734 }
 0x6d7   : > { %v1602_v52 = vsel %vm983_vm2, %v3735_v51, 0.0 }
 0x6d8   : > { %1603 = vadd.xlane.f32.xlu1 %v1602_v52 }
 0x6da   : > { %v3737_v53 = vpop.eup %3736 }
 0x6db   : > { %v1605_v54 = vsel %vm983_vm2, %v3737_v53, 0.0 }
 0x6dc   : > { %1606 = vadd.xlane.f32.xlu0 %v1605_v54 }
 0x75b   : > { %v1601_v55 = vpop.xlane.xlu0 %1600 }
 0x75c   : > { %3738 = vrcp.f32 %v1601_v55 }
 0x75d   : > { %v1598_v56 = vpop.xlane.xlu1 %1597 }
 0x75e   : > { %3740 = vrcp.f32 %v1598_v56 }
 0x761   : > { %v1604_v57 = vpop.xlane.xlu1 %1603 }
 0x762   : > { %3742 = vrcp.f32 %v1604_v57 }
 0x765   : > { %v1607_v58 = vpop.xlane.xlu0 %1606 }
 0x766   : > { %3744 = vrcp.f32 %v1607_v58 }
 0x769   : > { %v3739_v59 = vpop.eup %3738 }
 0x76a   : > { %v1613_v60 = vmul.f32 %v3739_v59, %v3731_v47 }
 0x76b   : > { %v3741_v61 = vpop.eup %3740 }
 0x76c   : > { %v1612_v62 = vmul.f32 %v3741_v61, %v3733_v49 }
 0x76f   : > { %v3743_v63 = vpop.eup %3742 }
 0x770   : > { %v1614_v0 = vmul.f32 %v3743_v63, %v3735_v51  ;;  %1618 = sbr.rel (%p3187_p12) target bundleno = 1911 (0x777), region = 84 }
 0x773   : > { %v3745_v1 = vpop.eup %3744 }
 0x774   : > { %v1615_v2 = vmul.f32 %v3745_v1, %v3737_v53 }
 0x775   : > { %3201 = vst.msk [vmem:[%s4197_s23 + $0x20] sm:$0xff] %vm983_vm2, %v1612_v62  ;;  %3202 = vst.msk [vmem:[%s4197_s23 + $0x28] sm:$0xff] %vm983_vm2, %v1613_v60 }
 0x776   : > { %3203 = vst.msk [vmem:[%s4197_s23 + $0x30] sm:$0xff] %vm983_vm2, %v1614_v0  ;;  %3204 = vst.msk [vmem:[%s4197_s23 + $0x38] sm:$0xff] %vm983_vm2, %v1615_v2 }
 0x777 PF: > { %3468 = vmatprep.mubr.msk.f32.mxu0 %vm983_vm2, %v1612_v62  ;;  %3475 = vmatprep.mubr.msk.f32.mxu1 %vm983_vm2, %v1614_v0  ;;  %s3933_s8 = smov 48   ;;  %s3934_s25 = smov 16   ;;  %v3218_v61 = vld [vmem:[%s4186_s18 + $0x30] sm:$0xff]  ;;  %v3217_v62 = vld [vmem:[%s4186_s18 + $0x28] sm:$0xff]  ;;  %v3216_v63 = vld [vmem:[%s4186_s18 + $0x20] sm:$0xff]  ;;  %vm2467_vm9 = vcmask 523264  }
 0x778   : > { %1626 = vrot.lane.b32.xlu0 %v4264_v7, %s3933_s8  ;;  %1713 = vrot.lane.b32.xlu1 %v4272_v13, %s3933_s8  ;;  %v1821_v7 = vld [vmem:[%s4163_s28 + $0x18] sm:$0xff]  ;;  %v1819_v13 = vld [vmem:[%s4163_s28 + $0x8] sm:$0xff]  ;;  %s4832_s14 = scalar_lea.vmem %s4755_s7, %s4140_s13  ;;  %s4833_s1 = sld [smem:[#allocation34_spill]] }
 0x779   : > { %v2117_v0 = vld [vmem:[%s4186_s18 + $0x18] sm:$0xff]  ;;  %v2116_v1 = vld [vmem:[%s4186_s18 + $0x10] sm:$0xff]  ;;  %p3266_p13 = scmp.ge.s32.totalorder %s3918_s17, 1 }
 0x77c   : > { %1624 = vrot.lane.b32.xlu0 %v4266_v10, %s3933_s8  ;;  %1711 = vrot.lane.b32.xlu1 %v4274_v14, %s3933_s8  ;;  %v1820_v10 = vld [vmem:[%s4163_s28 + $0x10] sm:$0xff]  ;;  %v1818_v14 = vld [vmem:[%s4163_s28] sm:$0xff] }
 0x77e   : > { %s4834_s27 = scalar_lea.vmem %s4833_s1, %s4140_s13 }
 0x7ea   : > { %v1627_v3 = vpop.permute.xlu0 %1626  ;;  %v1714_v8 = vpop.permute.xlu1 %1713 }
 0x7eb   : > { %3464 = vmatprep.subr.mxu0 %v1627_v3  ;;  %3471 = vmatprep.subr.mxu1 %v1714_v8 }
 0x7ec   : > { %3465 = vmatpush3.msra.mxu0 %v1627_v3  ;;  %3472 = vmatpush3.msra.mxu1 %v1714_v8  ;;  %v2115_v3 = vld [vmem:[%s4186_s18 + $0x8] sm:$0xff]  ;;  %v2114_v8 = vld [vmem:[%s4186_s18] sm:$0xff] }
 0x7ee   : > { %v1625_v11 = vpop.permute.xlu0 %1624  ;;  %v1712_v12 = vpop.permute.xlu1 %1711 }
 0x7ef   : > { %3466 = vmatprep.subr.mxu0 %v1625_v11  ;;  %3473 = vmatprep.subr.mxu1 %v1712_v12 }
 0x7f0   : > { %3467 = vmatpush3.msra.mxu0 %v1625_v11  ;;  %3474 = vmatpush3.msra.mxu1 %v1712_v12 }
 0x7f1   : > { %3469 = vmatmul.mubr.msk.f32.vlgmr.msra.gmra.mxu0 %vm983_vm2, %v1613_v60  ;;  %3476 = vmatmul.mubr.msk.f32.vlgmr.msra.gmra.mxu1 %vm983_vm2, %v1615_v2  ;;  %v3219_v60 = vld [vmem:[%s4186_s18 + $0x38] sm:$0xff] }
 0x7f2   : > { %3478 = vmatprep.subr.mxu0 %v1821_v7  ;;  %3492 = vmatprep.subr.mxu1 %v3219_v60  ;;  %v3231_v2 = vld [vmem:[%s4186_s18 + $0x58] sm:$0xff] }
 0x7f3   : > { %3479 = vmatpush3.msra.mxu0 %v1821_v7  ;;  %3493 = vmatpush3.msra.mxu1 %v3219_v60 }
 0x7f4   : > { %3480 = vmatprep.subr.mxu0 %v1820_v10  ;;  %3494 = vmatprep.subr.mxu1 %v3218_v61 }
 0x7f5   : > { %3481 = vmatpush3.msra.mxu0 %v1820_v10  ;;  %3495 = vmatpush3.msra.mxu1 %v3218_v61 }
 0x7f6   : > { %3482 = vmatprep.subr.mxu0 %v1819_v13  ;;  %3496 = vmatprep.subr.mxu1 %v3217_v62 }
 0x7f7   : > { %3483 = vmatpush3.msra.mxu0 %v1819_v13  ;;  %3497 = vmatpush3.msra.mxu1 %v3217_v62 }
 0x7f8   : > { %3484 = vmatprep.subr.mxu0 %v1818_v14  ;;  %3498 = vmatprep.subr.mxu1 %v3216_v63 }
 0x7f9   : > { %3485 = vmatpush3.msra.mxu0 %v1818_v14  ;;  %3499 = vmatpush3.msra.mxu1 %v3216_v63 }
 0x7fa   : > { %3506 = vmatprep.subr.mxu0 %v2117_v0  ;;  %3520 = vmatprep.subr.mxu1 %v3231_v2 }
 0x8b1   : > { %v3470_v15 = vpop.f32.mrf.mxu0  ;;  %v3477_v16 = vpop.f32.mrf.mxu1 }
 0x8b2   : > { %1804 = vrot.lane.b32.xlu1 %v3470_v15, %s3934_s25 }
 0x8b3   : > { %v1702_v17 = vpop.f32.mrf.mxu0  ;;  %v1789_v18 = vpop.f32.mrf.mxu1 }
 0x8b4   : > { %1802 = vrot.lane.b32.xlu0 %v1702_v17, %s3934_s25 }
 0x8b6   : > { %1808 = vrot.lane.b32.xlu1 %v3477_v16, %s3934_s25 }
 0x8b8   : > { %1806 = vrot.lane.b32.xlu0 %v1789_v18, %s3934_s25 }
 0x924   : > { %v1805_v23 = vpop.permute.xlu1 %1804 }
 0x925   : > { %v1815_v26 = vsel %vm983_vm2, %v4339_v19, %v1805_v23  ;;  %v3213_v19 = vld [vmem:[%s4832_s14] ss:$0 sm:$0xff] }
 0x926   : > { %v1803_v24 = vpop.permute.xlu0 %1802 }
 0x927   : > { %v1814_v25 = vsel %vm983_vm2, %v4341_v20, %v1803_v24 }
 0x928   : > { %3486 = vmatprep.mubr.msk.f32.mxu0 %vm794_vm1, %v1814_v25  ;;  %v1809_v27 = vpop.permute.xlu1 %1808  ;;  %v2008_v25 = vlaneseq }
 0x929   : > { %3487 = vmatmul.mubr.msk.f32.vlgmr.msra.gmra.mxu0 %vm794_vm1, %v1815_v26  ;;  %v1817_v28 = vsel %vm983_vm2, %v4343_v21, %v1809_v27  ;;  %v3214_v27 = vld [vmem:[%s4834_s27] ss:$0 sm:$0xff] }
 0x92a   : > { %v1807_v29 = vpop.permute.xlu0 %1806  ;;  %3507 = vmatpush3.msra.mxu0 %v2117_v0 }
 0x92b   : > { %v1816_v30 = vsel %vm983_vm2, %v4345_v22, %v1807_v29  ;;  %3508 = vmatprep.subr.mxu0 %v2116_v1 }
 0x92c   : > { %3489 = vmatprep.mubr.msk.f32.mxu0 %vm794_vm1, %v1816_v30  ;;  %3509 = vmatpush3.msra.mxu0 %v2116_v1  ;;  %v4453_v30 = vshrl.u32 %v2008_v25, 7  ;;  %v2463_v25 = vld [vmem:[%s4195_s15 + $0x20] sm:$0xff] }
 0x92d   : > { %3490 = vmatmul.mubr.msk.f32.gmra.mxu0 %vm794_vm1, %v1817_v28  ;;  %3510 = vmatprep.subr.mxu0 %v2115_v3 }
 0x92e   : > { %3511 = vmatpush3.msra.mxu0 %v2115_v3  ;;  %vm2097_vm4 = vcmp.lt.s32.totalorder %v4453_v30, 1  ;;  %vm2321_vm5 = vcmp.lt.s32.totalorder %v4453_v30, 7 }
 0x92f   : > { %3512 = vmatprep.subr.mxu0 %v2114_v8 }
 0x930   : > { %3513 = vmatpush3.msra.mxu0 %v2114_v8 }
 0x9e9   : > { %v3488_v20 = vpop.f32.mrf.mxu0 }
 0x9ea   : > { %v1920_v31 = vadd.f32 %v3488_v20, %v4218_v6 }
 0x9eb   : > { %v1900_v32 = vpop.f32.mrf.mxu0 }
 0x9ec   : > { %v4395_v33 = vadd.f32 %v3213_v19, %v1920_v31  ;;  %v1919_v21 = vadd.f32 %v1900_v32, %v4214_v4  ;;  %v2017_v31 = vand.u32 15, %v4453_v30  ;;  %v2011_v32 = vadd.s32 16, %v4453_v30 }
 0x9ed   : > { %v3491_v34 = vpop.f32.mrf.mxu0 }
 0x9ee   : > { %v4398_v35 = vadd.f32 %v3213_v19, %v1919_v21  ;;  %v1922_v22 = vadd.f32 %v3491_v34, %v4224_v9  ;;  %v1939_v36 = vsel %vm794_vm1, %v4395_v33, 0.0  ;;  %v3215_v21 = vld [vmem:[%s739_s10] ss:$0 sm:$0xff] }
 0x9ef   : > { %1940 = vadd.xlane.f32.xlu1 %v1939_v36  ;;  %v1910_v37 = vpop.f32.mrf.mxu0 }
 0x9f0   : > { %v4403_v38 = vadd.f32 %v3213_v19, %v1922_v22  ;;  %v1921_v39 = vadd.f32 %v1910_v37, %v4216_v5  ;;  %v1936_v6 = vsel %vm794_vm1, %v4398_v35, 0.0  ;;  %v2010_v22 = vadd.s32 8, %v4453_v30 }
 0x9f1   : > { %1937 = vadd.xlane.f32.xlu0 %v1936_v6 }
 0x9f2   : > { %v4408_v40 = vadd.f32 %v3213_v19, %v1921_v39  ;;  %v1945_v4 = vsel %vm794_vm1, %v4403_v38, 0.0 }
 0x9f4   : > { %v1942_v9 = vsel %vm794_vm1, %v4408_v40, 0.0 }
 0x9f5   : > { %1946 = vadd.xlane.f32.xlu0 %v1945_v4  ;;  %v4465_v4 = vadd.s32 4294967295, %v2017_v31  ;;  %v3242_v31 = vld [vmem:[%s4195_s15 + $0x48] sm:$0xff] }
 0x9f7   : > { %vm2081_vm3 = vcmp.ge.s32.totalorder %v4465_v4, 0 }
 0x9f9   : > { %1943 = vadd.xlane.f32.xlu0 %v1942_v9  ;;  %v2031_v9 = vand.u32 15, %v2011_v32  ;;  %v2459_v32 = vld [vmem:[%s4195_s15] sm:$0xff] }
 0xa78   : > { %v1941_v41 = vpop.xlane.xlu1 %1940 }
 0xa79   : > { %v1949_v42 = vmul.f32 0.03125, %v1941_v41  ;;  %v3230_v41 = vld [vmem:[%s4186_s18 + $0x50] sm:$0xff] }
 0xa7a   : > { %v1938_v43 = vpop.xlane.xlu0 %1937 }
 0xa7b   : > { %v4415_v44 = vsub.f32 %v4395_v33, %v1949_v42  ;;  %v1948_v5 = vmul.f32 0.03125, %v1938_v43  ;;  %v2024_v43 = vand.u32 15, %v2010_v22 }
 0xa7d   : > { %v4418_v45 = vsub.f32 %v4398_v35, %v1948_v5  ;;  %v1957_v46 = vmul.f32 %v4415_v44, %v4415_v44  ;;  %v2012_v5 = vadd.s32 24, %v4453_v30 }
 0xa7e   : > { %v1947_v47 = vpop.xlane.xlu0 %1946 }
 0xa7f   : > { %v1951_v48 = vmul.f32 0.03125, %v1947_v47  ;;  %v1963_v49 = vsel %vm794_vm1, %v1957_v46, 0.0  ;;  %v1956_v50 = vmul.f32 %v4418_v45, %v4418_v45  ;;  %v3229_v47 = vld [vmem:[%s4186_s18 + $0x48] sm:$0xff] }
 0xa80   : > { %1964 = vadd.xlane.f32.xlu0 %v1963_v49 }
 0xa81   : > { %v4426_v51 = vsub.f32 %v4403_v38, %v1951_v48  ;;  %v1960_v52 = vsel %vm794_vm1, %v1956_v50, 0.0  ;;  %v4474_v48 = vadd.s32 4294967295, %v2031_v9 }
 0xa82   : > { %1961 = vadd.xlane.f32.xlu1 %v1960_v52  ;;  %v1944_v53 = vpop.xlane.xlu0 %1943  ;;  %v3228_v52 = vld [vmem:[%s4186_s18 + $0x40] sm:$0xff] }
 0xa83   : > { %v1950_v54 = vmul.f32 0.03125, %v1944_v53  ;;  %v1959_v55 = vmul.f32 %v4426_v51, %v4426_v51  ;;  %v4477_v53 = vadd.s32 1, %v2024_v43  ;;  %vm2083_vm6 = vcmp.ge.s32.totalorder %v4474_v48, 0 }
 0xa85   : > { %v4432_v56 = vsub.f32 %v4408_v40, %v1950_v54  ;;  %v1969_v57 = vsel %vm794_vm1, %v1959_v55, 0.0  ;;  %v2038_v55 = vand.u32 15, %v2012_v5  ;;  %vm2070_vm7 = vcmp.lt.s32.totalorder %v4477_v53, 16 }
 0xa86   : > { %1970 = vadd.xlane.f32.xlu1 %v1969_v57 }
 0xa87   : > { %v1958_v58 = vmul.f32 %v4432_v56, %v4432_v56 }
 0xa89   : > { %v1966_v59 = vsel %vm794_vm1, %v1958_v58, 0.0 }
 0xa8a   : > { %1967 = vadd.xlane.f32.xlu0 %v1966_v59 }
 0xb09   : > { %v1965_v11 = vpop.xlane.xlu0 %1964 }
 0xb0a   : > { %v1973_v12 = vmul.f32 0.03125, %v1965_v11 }
 0xb0b   : > { %v1962_v7 = vpop.xlane.xlu1 %1961 }
 0xb0c   : > { %v1977_v10 = vadd.f32 1e-05, %v1973_v12  ;;  %v1972_v13 = vmul.f32 0.03125, %v1962_v7 }
 0xb0e   : > { %3746 = vrsqrt.f32 %v1977_v10  ;;  %v1976_v14 = vadd.f32 1e-05, %v1972_v13 }
 0xb0f   : > { %v1971_v15 = vpop.xlane.xlu1 %1970 }
 0xb10   : > { %3748 = vrsqrt.f32 %v1976_v14  ;;  %v1975_v16 = vmul.f32 0.03125, %v1971_v15  ;;  %v2466_v15 = vld [vmem:[%s4195_s15 + $0x38] sm:$0xff] }
 0xb11   : > { %3534 = vmatprep.subr.mxu0 %v2466_v15 }
 0xb12   : > { %v1979_v17 = vadd.f32 1e-05, %v1975_v16  ;;  %v3248_v16 = vld [vmem:[%s4195_s15 + $0x78] sm:$0xff] }
 0xb13   : > { %v1968_v18 = vpop.xlane.xlu0 %1967 }
 0xb14   : > { %3750 = vrsqrt.f32 %v1979_v17  ;;  %v1974_v23 = vmul.f32 0.03125, %v1968_v18  ;;  %v2465_v17 = vld [vmem:[%s4195_s15 + $0x30] sm:$0xff] }
 0xb15   : > { %v3247_v18 = vld [vmem:[%s4195_s15 + $0x70] sm:$0xff] }
 0xb16   : > { %v1978_v24 = vadd.f32 1e-05, %v1974_v23  ;;  %v2464_v23 = vld [vmem:[%s4195_s15 + $0x28] sm:$0xff] }
 0xb18   : > { %3752 = vrsqrt.f32 %v1978_v24  ;;  %v3246_v24 = vld [vmem:[%s4195_s15 + $0x68] sm:$0xff] }
 0xb1b   : > { %v3747_v26 = vpop.eup %3746 }
 0xb1c   : > { %v1985_v28 = vmul.f32 %v3747_v26, %v4415_v44  ;;  %v3245_v26 = vld [vmem:[%s4195_s15 + $0x60] sm:$0xff] }
 0xb1d   : > { %v3749_v29 = vpop.eup %3748 }
 0xb1e   : > { %v1984_v20 = vmul.f32 %v3749_v29, %v4418_v45  ;;  %v1995_v19 = vmul.f32 %v3214_v27, %v1985_v28  ;;  %v3244_v28 = vld [vmem:[%s4195_s15 + $0x58] sm:$0xff]  ;;  %v2461_v29 = vld [vmem:[%s4195_s15 + $0x10] sm:$0xff] }
 0xb20   : > { %v1994_v34 = vmul.f32 %v3214_v27, %v1984_v20  ;;  %v2005_v6 = vadd.f32 %v3215_v21, %v1995_v19  ;;  %v3243_v20 = vld [vmem:[%s4195_s15 + $0x50] sm:$0xff]  ;;  %v2460_v19 = vld [vmem:[%s4195_s15 + $0x8] sm:$0xff] }
 0xb21   : > { %v3751_v36 = vpop.eup %3750 }
 0xb22   : > { %v1987_v37 = vmul.f32 %v3751_v36, %v4426_v51  ;;  %v2004_v39 = vadd.f32 %v3215_v21, %v1994_v34  ;;  %v2094_v58 = vrot.slane %v2005_v6, 7  ;;  %v2318_v60 = vrot.slane %v2005_v6, 1  ;;  %v3260_v34 = vld [vmem:[%s4195_s15 + $0xb8] sm:$0xff] }
 0xb24   : > { %3500 = vmatprep.mubr.msk.f32.mxu1 %vm794_vm1, %v2004_v39  ;;  %v1997_v42 = vmul.f32 %v3214_v27, %v1987_v37  ;;  %v2093_v50 = vrot.slane %v2004_v39, 7  ;;  %v2317_v54 = vrot.slane %v2004_v39, 1 }
 0xb25   : > { %v3753_v44 = vpop.eup %3752  ;;  %3501 = vmatmul.mubr.msk.f32.vlgmr.msra.gmra.mxu1 %vm794_vm1, %v2005_v6 }
 0xb26   : > { %3521 = vmatpush3.msra.mxu1 %v3231_v2  ;;  %v1986_v45 = vmul.f32 %v3753_v44, %v4432_v56  ;;  %v2007_v46 = vadd.f32 %v3215_v21, %v1997_v42  ;;  %v2100_v62 = vsel %vm2097_vm4, %v2093_v50, %v2094_v58  ;;  %v2324_v0 = vsel %vm2321_vm5, %v2317_v54, %v2318_v60 }
 0xb27   : > { %3522 = vmatprep.subr.mxu1 %v3230_v41  ;;  %v4495_v2 = vadd.s32 1, %v2038_v55 }
 0xb28   : > { %3523 = vmatpush3.msra.mxu1 %v3230_v41  ;;  %v1996_v49 = vmul.f32 %v3214_v27, %v1986_v45  ;;  %v2096_v51 = vrot.slane %v2007_v46, 7  ;;  %v2320_v1 = vrot.slane %v2007_v46, 1  ;;  %v2462_v27 = vld [vmem:[%s4195_s15 + $0x18] sm:$0xff]  ;;  %v3236_v45 = vld [vmem:[%s747_s11] ss:$0 sm:$0xff] }
 0xb29   : > { %3524 = vmatprep.subr.mxu1 %v3229_v47  ;;  %vm2072_vm8 = vcmp.lt.s32.totalorder %v4495_v2, 16 }
 0xb2a   : > { %v2006_v56 = vadd.f32 %v3215_v21, %v1996_v49  ;;  %v2101_v57 = vsel %vm2097_vm4, %v2096_v51, %v2093_v50  ;;  %3525 = vmatpush3.msra.mxu1 %v3229_v47  ;;  %v2325_v13 = vsel %vm2321_vm5, %v2320_v1, %v2317_v54  ;;  %v3241_v21 = vld [vmem:[%s4195_s15 + $0x40] sm:$0xff] }
 0xb2b   : > { %v2110_v59 = vsel %vm2081_vm3, %v2101_v57, 0.0  ;;  %3526 = vmatprep.subr.mxu1 %v3228_v52  ;;  %v2337_v14 = vsel %vm2072_vm8, %v2325_v13, 0.0 }
 0xb2c   : > { %3503 = vmatprep.mubr.msk.f32.mxu1 %vm794_vm1, %v2006_v56  ;;  %v2319_v61 = vrot.slane %v2006_v56, 1  ;;  %3514 = vmatprep.mubr.msk.f32.mxu0 %vm794_vm1, %v2110_v59  ;;  %v2095_v63 = vrot.slane %v2006_v56, 7 }
 0xb2d   : > { %3504 = vmatmul.mubr.msk.f32.gmra.mxu1 %vm794_vm1, %v2007_v46  ;;  %3515 = vmatmul.mubr.msk.f32.vlgmr.msra.gmra.mxu0 %vm794_vm1, %v2100_v62 }
 0xb2e   : > { %3528 = vmatprep.mubr.msk.f32.mxu1 %vm794_vm1, %v2324_v0  ;;  %3527 = vmatpush3.msra.mxu1 %v3228_v52  ;;  %v2099_v3 = vsel %vm2097_vm4, %v2094_v58, %v2095_v63  ;;  %v2323_v8 = vsel %vm2321_vm5, %v2318_v60, %v2319_v61  ;;  %v2098_v7 = vsel %vm2097_vm4, %v2095_v63, %v2096_v51  ;;  %v3259_v63 = vld [vmem:[%s4195_s15 + $0xb0] sm:$0xff] }
 0xb2f   : > { %v2112_v11 = vsel %vm2083_vm6, %v2099_v3, 0.0  ;;  %v2335_v12 = vsel %vm2070_vm7, %v2323_v8, 0.0  ;;  %v2322_v10 = vsel %vm2321_vm5, %v2319_v61, %v2320_v1  ;;  %3556 = vmatprep.subr.mxu1 %v3248_v16  ;;  %3535 = vmatpush3.msra.mxu0 %v2466_v15  ;;  %v3258_v1 = vld [vmem:[%s4195_s15 + $0xa8] sm:$0xff]  ;;  %v3257_v8 = vld [vmem:[%s4195_s15 + $0xa0] sm:$0xff] }
 0xb30   : > { %3517 = vmatprep.mubr.msk.f32.mxu0 %vm794_vm1, %v2112_v11  ;;  %3536 = vmatprep.subr.mxu0 %v2465_v17  ;;  %v3256_v11 = vld [vmem:[%s4195_s15 + $0x98] sm:$0xff] }
 0xb31   : > { %3518 = vmatmul.mubr.msk.f32.gmra.mxu0 %vm794_vm1, %v2098_v7  ;;  %3529 = vmatmul.mubr.msk.f32.vlgmr.msra.gmra.mxu1 %vm794_vm1, %v2335_v12  ;;  %v3255_v12 = vld [vmem:[%s4195_s15 + $0x90] sm:$0xff]  ;;  %v3254_v7 = vld [vmem:[%s4195_s15 + $0x88] sm:$0xff] }
 0xb32   : > { %3531 = vmatprep.mubr.msk.f32.mxu1 %vm794_vm1, %v2322_v10  ;;  %3557 = vmatpush3.msra.mxu1 %v3248_v16  ;;  %v3253_v10 = vld [vmem:[%s4195_s15 + $0x80] sm:$0xff] }
 0xb33   : > { %3537 = vmatpush3.msra.mxu0 %v2465_v17  ;;  %3558 = vmatprep.subr.mxu1 %v3247_v18 }
 0xb34   : > { %3538 = vmatprep.subr.mxu0 %v2464_v23  ;;  %3559 = vmatpush3.msra.mxu1 %v3247_v18 }
 0xb35   : > { %3532 = vmatmul.mubr.msk.f32.gmra.mxu1 %vm794_vm1, %v2337_v14  ;;  %3539 = vmatpush3.msra.mxu0 %v2464_v23 }
 0xb36   : > { %3560 = vmatprep.subr.mxu1 %v3246_v24  ;;  %3540 = vmatprep.subr.mxu0 %v2463_v25 }
 0xb37   : > { %3561 = vmatpush3.msra.mxu1 %v3246_v24  ;;  %3541 = vmatpush3.msra.mxu0 %v2463_v25 }
 0xb38   : > { %3562 = vmatprep.subr.mxu1 %v3245_v26  ;;  %3542 = vmatprep.subr.mxu0 %v2462_v27 }
 0xb39   : > { %3563 = vmatpush3.msra.mxu1 %v3245_v26  ;;  %3543 = vmatpush3.msra.mxu0 %v2462_v27 }
 0xb3a   : > { %3564 = vmatprep.subr.mxu1 %v3244_v28  ;;  %3544 = vmatprep.subr.mxu0 %v2461_v29 }
 0xb3b   : > { %3565 = vmatpush3.msra.mxu1 %v3244_v28  ;;  %3545 = vmatpush3.msra.mxu0 %v2461_v29 }
 0xb3c   : > { %3566 = vmatprep.subr.mxu1 %v3243_v20  ;;  %3546 = vmatprep.subr.mxu0 %v2460_v19 }
 0xb3d   : > { %3567 = vmatpush3.msra.mxu1 %v3243_v20  ;;  %3547 = vmatpush3.msra.mxu0 %v2460_v19 }
 0xb3e   : > { %3568 = vmatprep.subr.mxu1 %v3242_v31  ;;  %3548 = vmatprep.subr.mxu0 %v2459_v32 }
 0xb3f   : > { %3569 = vmatpush3.msra.mxu1 %v3242_v31  ;;  %3549 = vmatpush3.msra.mxu0 %v2459_v32 }
 0xb40   : > { %3570 = vmatprep.subr.mxu1 %v3241_v21  ;;  %3578 = vmatprep.subr.mxu0 %v3260_v34 }
 0xb41   : > { %3571 = vmatpush3.msra.mxu1 %v3241_v21 }
 0xbe5   : > { %v3502_v22 = vpop.f32.mrf.mxu1 }
 0xbe7   : > { %v2201_v36 = vpop.f32.mrf.mxu1 }
 0xbed   : > { %v3505_v37 = vpop.f32.mrf.mxu1  ;;  %v3516_v39 = vpop.f32.mrf.mxu0 }
 0xbee   : > { %v2304_v41 = vadd.f32 %v3516_v39, %v3502_v22 }
 0xbef   : > { %v2211_v6 = vpop.f32.mrf.mxu1  ;;  %v2298_v9 = vpop.f32.mrf.mxu0 }
 0xbf0   : > { %v2299_v44 = vadd.f32 %v2298_v9, %v2201_v36 }
 0xbf1   : > { %v3519_v42 = vpop.f32.mrf.mxu0  ;;  %v3530_v43 = vpop.f32.mrf.mxu1 }
 0xbf2   : > { %v2441_v5 = vadd.f32 %v3530_v43, %v2304_v41  ;;  %v2314_v49 = vadd.f32 %v3519_v42, %v3505_v37 }
 0xbf3   : > { %v2308_v46 = vpop.f32.mrf.mxu0  ;;  %v2421_v47 = vpop.f32.mrf.mxu1 }
 0xbf4   : > { %v2440_v50 = vadd.f32 %v2421_v47, %v2299_v44  ;;  %v2452_v51 = vadd.f32 %v3236_v45, %v2441_v5  ;;  %v2309_v54 = vadd.f32 %v2308_v46, %v2211_v6  ;;  %v3265_v44 = vld [vmem:[%s755_s19] ss:$0 sm:$0xff] }
 0xbf5   : > { %v3533_v52 = vpop.f32.mrf.mxu1 }
 0xbf6   : > { %v2451_v55 = vadd.f32 %v3236_v45, %v2440_v50  ;;  %v2443_v56 = vadd.f32 %v3533_v52, %v2314_v49  ;;  %v2456_v60 = vmax.f32 %v2452_v51, 0.0 }
 0xbf7   : > { %v2431_v57 = vpop.f32.mrf.mxu1 }
 0xbf8   : > { %v2455_v58 = vmax.f32 %v2451_v55, 0.0  ;;  %v2442_v59 = vadd.f32 %v2431_v57, %v2309_v54  ;;  %v2454_v61 = vadd.f32 %v3236_v45, %v2443_v56 }
 0xbfa   : > { %v2453_v62 = vadd.f32 %v3236_v45, %v2442_v59  ;;  %3550 = vmatprep.mubr.msk.f32.mxu0 %vm2467_vm9, %v2455_v58  ;;  %3572 = vmatprep.mubr.msk.f32.mxu1 %vm2467_vm9, %v2455_v58  ;;  %v2458_v3 = vmax.f32 %v2454_v61, 0.0 }
 0xbfb   : > { %3551 = vmatmul.mubr.msk.f32.vlgmr.msra.gmra.mxu0 %vm2467_vm9, %v2456_v60  ;;  %3573 = vmatmul.mubr.msk.f32.vlgmr.msra.gmra.mxu1 %vm2467_vm9, %v2456_v60 }
 0xbfc   : > { %v2457_v0 = vmax.f32 %v2453_v62, 0.0  ;;  %3579 = vmatpush3.msra.mxu0 %v3260_v34 }
 0xbfd   : > { %3580 = vmatprep.subr.mxu0 %v3259_v63 }
 0xbfe   : > { %3581 = vmatpush3.msra.mxu0 %v3259_v63  ;;  %3553 = vmatprep.mubr.msk.f32.mxu0 %vm2467_vm9, %v2457_v0 }
 0xbff   : > { %3575 = vmatprep.mubr.msk.f32.mxu1 %vm2467_vm9, %v2457_v0  ;;  %3582 = vmatprep.subr.mxu0 %v3258_v1 }
 0xc00   : > { %3554 = vmatmul.mubr.msk.f32.gmra.mxu0 %vm2467_vm9, %v2458_v3  ;;  %3576 = vmatmul.mubr.msk.f32.gmra.mxu1 %vm2467_vm9, %v2458_v3 }
 0xc01   : > { %3583 = vmatpush3.msra.mxu0 %v3258_v1  ;;  %3594 = vmatprep.mubr.msk.f32.mxu0 %vm2467_vm9, %v2455_v58 }
 0xc02   : > { %3584 = vmatprep.subr.mxu0 %v3257_v8 }
 0xc03   : > { %3585 = vmatpush3.msra.mxu0 %v3257_v8 }
 0xc04   : > { %3586 = vmatprep.subr.mxu0 %v3256_v11 }
 0xc05   : > { %3587 = vmatpush3.msra.mxu0 %v3256_v11 }
 0xc06   : > { %3588 = vmatprep.subr.mxu0 %v3255_v12 }
 0xc07   : > { %3589 = vmatpush3.msra.mxu0 %v3255_v12 }
 0xc08   : > { %3590 = vmatprep.subr.mxu0 %v3254_v7 }
 0xc09   : > { %3591 = vmatpush3.msra.mxu0 %v3254_v7 }
 0xc0a   : > { %3592 = vmatprep.subr.mxu0 %v3253_v10 }
 0xc0b   : > { %3593 = vmatpush3.msra.mxu0 %v3253_v10 }
 0xc0c   : > { %3595 = vmatmul.mubr.msk.f32.vlgmr.msra.gmra.mxu0 %vm2467_vm9, %v2456_v60 }
 0xc0d   : > { %3597 = vmatprep.mubr.msk.f32.mxu0 %vm2467_vm9, %v2457_v0 }
 0xc10   : > { %3598 = vmatmul.mubr.msk.f32.gmra.mxu0 %vm2467_vm9, %v2458_v3 }
 0xcbb   : > { %v3552_v13 = vpop.f32.mrf.mxu0  ;;  %v3574_v17 = vpop.f32.mrf.mxu1 }
 0xcbc   : > { %v2566_v27 = vrot.slane %v3552_v13, 7 }
 0xcbd   : > { %v2546_v14 = vpop.f32.mrf.mxu0  ;;  %v2656_v26 = vpop.f32.mrf.mxu1 }
 0xcbe   : > { %v2565_v23 = vrot.slane %v2546_v14, 7 }
 0xcc0   : > { %v3555_v15 = vpop.f32.mrf.mxu0  ;;  %v3577_v31 = vpop.f32.mrf.mxu1  ;;  %v2571_v6 = vsel %vm2097_vm4, %v2565_v23, %v2566_v27 }
 0xcc1   : > { %v2568_v16 = vrot.slane %v3555_v15, 7  ;;  %v2676_v49 = vadd.f32 %v3574_v17, %v2571_v6 }
 0xcc2   : > { %v2556_v18 = vpop.f32.mrf.mxu0  ;;  %v2666_v43 = vpop.f32.mrf.mxu1 }
 0xcc3   : > { %v2572_v24 = vsel %vm2097_vm4, %v2568_v16, %v2565_v23  ;;  %v2567_v25 = vrot.slane %v2556_v18, 7 }
 0xcc4   : > { %v2573_v29 = vsel %vm2081_vm3, %v2572_v24, 0.0 }
 0xcc5   : > { %v2570_v20 = vsel %vm2097_vm4, %v2566_v27, %v2567_v25  ;;  %v2675_v34 = vadd.f32 %v2656_v26, %v2573_v29  ;;  %v2569_v22 = vsel %vm2097_vm4, %v2567_v25, %v2568_v16 }
 0xcc6   : > { %v2575_v37 = vsel %vm2083_vm6, %v2570_v20, 0.0  ;;  %v2678_v42 = vadd.f32 %v3577_v31, %v2569_v22 }
 0xcc7   : > { %v2677_v45 = vadd.f32 %v2666_v43, %v2575_v37 }
 0xccc   : > { %v3596_v28 = vpop.f32.mrf.mxu0 }
 0xccd   : > { %v2774_v32 = vrot.slane %v3596_v28, 1 }
 0xcce   : > { %v2754_v19 = vpop.f32.mrf.mxu0 }
 0xccf   : > { %v2773_v21 = vrot.slane %v2754_v19, 1 }
 0xcd0   : > { %v3599_v36 = vpop.f32.mrf.mxu0 }
 0xcd1   : > { %v2779_v4 = vsel %vm2321_vm5, %v2773_v21, %v2774_v32  ;;  %v2776_v39 = vrot.slane %v3599_v36, 1 }
 0xcd2   : > { %v2785_v9 = vadd.f32 %v2779_v4, %v2675_v34  ;;  %v2764_v41 = vpop.f32.mrf.mxu0 }
 0xcd3   : > { %v2780_v48 = vsel %vm2321_vm5, %v2776_v39, %v2773_v21  ;;  %v2775_v5 = vrot.slane %v2764_v41, 1 }
 0xcd4   : > { %v2789_v46 = vadd.f32 %v2785_v9, %v4398_v35  ;;  %v2784_v47 = vsel %vm2072_vm8, %v2780_v48, 0.0 }
 0xcd5   : > { %v2788_v50 = vadd.f32 %v2784_v47, %v2678_v42  ;;  %v2777_v51 = vsel %vm2321_vm5, %v2775_v5, %v2776_v39  ;;  %v2778_v52 = vsel %vm2321_vm5, %v2774_v32, %v2775_v5 }
 0xcd6   : > { %v2800_v54 = vadd.f32 %v3265_v44, %v2789_v46  ;;  %v2782_v55 = vsel %vm2070_vm7, %v2778_v52, 0.0  ;;  %v2787_v56 = vadd.f32 %v2777_v51, %v2677_v45 }
 0xcd7   : > { %v2792_v57 = vadd.f32 %v2788_v50, %v4403_v38  ;;  %v2786_v58 = vadd.f32 %v2782_v55, %v2676_v49  ;;  %2807 = sbr.rel (%p3266_p13) target bundleno = 3294 (0xcde), region = 88 }
 0xcd8   : > { %v2791_v35 = vadd.f32 %v2787_v56, %v4408_v40 }
 0xcd9   : > { %v2803_v2 = vadd.f32 %v3265_v44, %v2792_v57  ;;  %v2790_v59 = vadd.f32 %v2786_v58, %v4395_v33 }
 0xcda   : > { %v2802_v60 = vadd.f32 %v3265_v44, %v2791_v35 }
 0xcdb   : > { %v2801_v61 = vadd.f32 %v3265_v44, %v2790_v59 }
 0xcdc   : > { %2808 = vst.msk [vmem:[#allocation2] sm:$0xff] %vm794_vm1, %v2800_v54  ;;  %2810 = vst.msk [vmem:[#allocation2 + $0x10] sm:$0xff] %vm794_vm1, %v2802_v60 }
 0xcdd   : > { %2809 = vst.msk [vmem:[#allocation2 + $0x8] sm:$0xff] %vm794_vm1, %v2801_v61  ;;  %2811 = vst.msk [vmem:[#allocation2 + $0x18] sm:$0xff] %vm794_vm1, %v2803_v2 }
 0xcde PF: > { %p3267_p0 = scmp.ne.s32.totalorder %s3918_s17, 1 }
 0xce0   : > { %2815 = sbr.rel (%p3267_p0) target bundleno = 3303 (0xce7), region = 92 }
 0xce5   : > { %2816 = vst.msk [vmem:[#allocation5] sm:$0xff] %vm794_vm1, %v2800_v54  ;;  %2817 = vst.msk [vmem:[#allocation5 + $0x8] sm:$0xff] %vm794_vm1, %v2801_v61 }
 0xce6   : > { %2818 = vst.msk [vmem:[#allocation5 + $0x10] sm:$0xff] %vm794_vm1, %v2802_v60  ;;  %2819 = vst.msk [vmem:[#allocation5 + $0x18] sm:$0xff] %vm794_vm1, %v2803_v2 }
 0xce7 PF: > { %s2820_s13 = sshra.s32 %s3918_s17, 7  ;;  %s4606_s19 = sand.u32 127, %s3918_s17 }
 0xce8   : > { %s4608_s20 = sshll.u32 %s2820_s13, 7 }
 0xce9   : > { %s3293_s29 = sadd.s32 256, %s4608_s20 }
 0xcea   : > { %s2826_s24 = sadd.s32 %s3293_s29, %s4606_s19 }
 0xceb   : > { %s2827_s8 = sld [smem:[#allocation4 + %s2826_s24]] }
 0xcf1   : > { %p3269_p2 = scmp.ne.s32.totalorder %s2827_s8, 1 }
 0xcf3   : > { %2831 = sbr.rel (%p3269_p2) target bundleno = 3322 (0xcfa), region = 96 }
 0xcf8   : > { %2832 = vst.msk [vmem:[%s4199_s26] sm:$0xff] %vm794_vm1, %v2800_v54  ;;  %2833 = vst.msk [vmem:[%s4199_s26 + $0x8] sm:$0xff] %vm794_vm1, %v2801_v61 }
 0xcf9   : > { %2834 = vst.msk [vmem:[%s4199_s26 + $0x10] sm:$0xff] %vm794_vm1, %v2802_v60  ;;  %2835 = vst.msk [vmem:[%s4199_s26 + $0x18] sm:$0xff] %vm794_vm1, %v2803_v2 }
 0xcfa PF: > { %s4838_s17 = sld [smem:[#allocation21_spill]]  ;;  %s3295_s30 = sadd.s32 128, %s4608_s20 }
 0xcfb   : > { %s2872_s9 = sadd.s32 %s3295_s30, %s4606_s19  ;;  %s2883_s1 = sshll.u32 %s4197_s23, 4  ;;  %s4642_s1 = int_to_ptr.vmem [resolvable:$true] %s2883_s1 }
 0xcfc   : > { %s3604_s27 = scalar_select %p4094_p9, [#allocation4], [#allocation10] }
 0xcfd   : > { %s4864_s9 = smov (!%p4094_p9, %s2872_s9), 0  ;;  %s3935_s16 = smov [#allocation5]  }
 0xcfe   : > { %s2873_s21 = sld [smem:[%s3604_s27 + %s4864_s9]]  ;;  %s2856_s4 = sshll.u32 %s3935_s16, 4  ;;  %s2857_s4 = int_to_ptr.vmem [resolvable:$true] %s2856_s4 }
 0xcff   : > { %s3298_s18 = sadd.s32 384, %s4608_s20  ;;  %s3766_s10 = scalar_lea.vmem %s2857_s4, 512 }
 0xd00   : > { %s4839_s25 = sadd.s32 4294967295, %s4838_s17   ;;  %p3767_p4 = scmp.ne.s32.totalorder %s2857_s4, %s3766_s10 }
 0xd01   : > { %s4622_s14 = sand.u32 1, %s4839_s25   ;;  %p3773_p8 = scmp.lt.s32.totalorder %s2857_s4, %s2857_s4 }
 0xd02   : > { %p3768_p5 = pnand %p3767_p4, %p4086_p7  ;;  %p3774_p10 = scmp.lt.s32.totalorder %s3766_s10, %s3766_s10 }
 0xd04   : > { %p3769_p6 = pneg %p3768_p5  ;;  %p3775_p12 = por %p3774_p10, %p3773_p8 }
 0xd06   : > { %p3776_p13 = pnand %p3775_p12, %p3769_p6 }
 0xd08   : > { %3779 = shalt.err (!%p3776_p13)
}
 0xd09   : > { %s3936_s23 = smov 128   ;;  %s3937_s11 = smov 8  }
 0xd0a   : > { %s4843_s13 = sld [smem:[#allocation40_spill]]  ;;  %s2899_s20 = sadd.s32 %s3298_s18, %s4606_s19 }
 0xd0b   : > { %s3607_s29 = scalar_select %p4117_p1, [#allocation4], [#allocation11] }
 0xd0c   : > { %s4866_s20 = smov (!%p4117_p1, %s2899_s20), 0  ;;  %s3296_s24 = sshll.u32 %s2873_s21, 10 }
 0xd0d   : > { %s4844_s25 = sld [smem:[#allocation41_spill]]  ;;  %s2837_s27 = scalar_lea.sflag [#allocation8], %s4622_s14 }
 0xd0e   : > { %s4654_s9 = sld [smem:[%s3607_s29 + %s4866_s20]]  ;;  %s3790_s16 = scalar_lea.vmem %s4642_s1, 1024 }
 0xd0f   : > { %p3791_p0 = scmp.ne.s32.totalorder %s4642_s1, %s3790_s16 }
 0xd10   : > { %3603 = dma.vmem_to_hbm [thread:$0]  (%p4086_p7), %s2857_s4, 512, %s4843_s13, [#allocation6], %s3936_s23, %s3936_s23, %s3937_s11  }
 0xd11   : > { %p3792_p2 = pnand %p3791_p0, %p4094_p9  ;;  %s3938_s4 = smov [#allocation7]  }
 0xd12   : > { %s3794_s19 = sshll.u32 %s3938_s4, 4  ;;  %s3795_s19 = int_to_ptr.vmem [resolvable:$false] %s3794_s19 }
 0xd13   : > { %s4652_s30 = scalar_lea.hbm %s4844_s25, %s3296_s24  ;;  %p3793_p4 = pneg %p3792_p2 }
 0xd14   : > { %s3796_s18 = scalar_lea.vmem %s3795_s19, 2048  ;;  %p3797_p5 = scmp.lt.s32.totalorder %s4642_s1, %s3795_s19 }
 0xd15   : > { %p3798_p6 = scmp.lt.s32.totalorder %s3796_s18, %s3790_s16 }
 0xd17   : > { %p3799_p8 = por %p3798_p6, %p3797_p5 }
 0xd19   : > { %p3800_p10 = pnand %p3799_p8, %p3793_p4 }
 0xd1b   : > { %3803 = shalt.err (!%p3800_p10)
}
 0xd1c   : > { %s3804_s21 = scalar_lea.hbm %s4652_s30, 1024  ;;  %s3808_s12 = scalar_lea.hbm %s4844_s25, 2048 }
 0xd1d   : > { %p3805_p12 = scmp.ne.s32.totalorder %s4652_s30, %s3804_s21  ;;  %p3809_p0 = scmp.lt.s32.totalorder %s4652_s30, %s4844_s25 }
 0xd1e   : > { %p3810_p2 = scmp.lt.s32.totalorder %s3808_s12, %s3804_s21 }
 0xd1f   : > { %p3806_p13 = pnand %p3805_p12, %p4094_p9 }
 0xd20   : > { %p3811_p4 = por %p3810_p2, %p3809_p0 }
 0xd21   : > { %p3807_p3 = pneg %p3806_p13 }
 0xd23   : > { %p3812_p5 = pnand %p3811_p4, %p3807_p3 }
 0xd25   : > { %3815 = shalt.err (!%p3812_p5)
}
 0xd26   : > { %3606 = dma.vmem_to_hbm [thread:$0]  (%p4094_p9), %s4642_s1, 1024, %s4652_s30, %s2837_s27, %s3936_s23, %s3936_s23, %s3937_s11  }
 0xd27   : > { %s2910_s29 = sshll.u32 %s4199_s26, 4  ;;  %s3299_s24 = sshll.u32 %s4654_s9, 9  ;;  %s4683_s29 = int_to_ptr.vmem [resolvable:$true] %s2910_s29 }
 0xd28   : > { %s4845_s17 = sld [smem:[#allocation42_spill]]  ;;  %s3816_s19 = scalar_lea.vmem %s4683_s29, 512 }
 0xd29   : > { %p3817_p3 = scmp.ne.s32.totalorder %s4683_s29, %s3816_s19  ;;  %s3939_s18 = smov [#allocation9]  }
 0xd2a   : > { %s3820_s21 = sshll.u32 %s3939_s18, 4  ;;  %s3821_s21 = int_to_ptr.vmem [resolvable:$false] %s3820_s21 }
 0xd2b   : > { %p3818_p6 = pnand %p3817_p3, %p4117_p1  ;;  %s3822_s1 = scalar_lea.vmem %s3821_s21, 1024 }
 0xd2c   : > { %p3823_p9 = scmp.lt.s32.totalorder %s4683_s29, %s3821_s21  ;;  %p3824_p10 = scmp.lt.s32.totalorder %s3822_s1, %s3816_s19 }
 0xd2d   : > { %p3819_p8 = pneg %p3818_p6 }
 0xd2e   : > { %s4846_s16 = smov %s4845_s17  ;;  %s2909_s4 = scalar_lea.hbm %s4845_s17, %s3299_s24 }
 0xd2f   : > { %p3825_p12 = por %p3824_p10, %p3823_p9 }
 0xd31   : > { %p3826_p13 = pnand %p3825_p12, %p3819_p8 }
 0xd33   : > { %3829 = shalt.err (!%p3826_p13)
}
 0xd34   : > { %s3830_s26 = scalar_lea.hbm %s2909_s4, 512  ;;  %s3834_s10 = scalar_lea.hbm %s4846_s16, 512 }
 0xd35   : > { %p3831_p0 = scmp.ne.s32.totalorder %s2909_s4, %s3830_s26  ;;  %p3835_p5 = scmp.lt.s32.totalorder %s2909_s4, %s4846_s16 }
 0xd36   : > { %p3836_p3 = scmp.lt.s32.totalorder %s3834_s10, %s3830_s26 }
 0xd37   : > { %p3832_p2 = pnand %p3831_p0, %p4117_p1 }
 0xd38   : > { %p3837_p6 = por %p3836_p3, %p3835_p5 }
 0xd39   : > { %p3833_p4 = pneg %p3832_p2 }
 0xd3b   : > { %p3838_p11 = pnand %p3837_p6, %p3833_p4 }
 0xd3d   : > { %3841 = shalt.err (!%p3838_p11)
}
 0xd3e   : > { %3609 = dma.vmem_to_hbm [thread:$0]  (%p4117_p1), %s4683_s29, 512, %s2909_s4, %s2837_s27, %s3936_s23, %s3936_s23, %s3937_s11  }
 0xd3f   : > { %3881 = dma.done.wait (%p4086_p7), [#allocation6], 512  }
 0xd40   : > { %3883 = vsyncadd (%p4086_p7), [#allocation6], 4294966784 }
 0xd41 PF: > { %s4847_s13 = sld [smem:[#allocation21_spill]] }
 0xd42   : > { %s4848_s20 = sld [smem:[#allocation25_spill]] }
 0xd47   : > { %p3623_p11 = scmp.ge.s32.totalorder %s4847_s13, 2  ;;  %s4849_s24 = sadd.s32 4294967294, %s4847_s13  }
 0xd48   : > { %s2929_s22 = sand.u32 1, %s4849_s24   ;;  %p4850_p8 = scmp.ne.s32.totalorder %s4848_s20, 0 }
 0xd49   : > { %s2930_s8 = scalar_lea.sflag [#allocation8], %s2929_s22 }
 0xd4a   : > { %p3615_p9 = pnand %p3623_p11, %p4850_p8 }
 0xd4c   : > { %p3616_p10 = pneg %p3615_p9 }
 0xd4e   : > { %3885 = dma.done.wait (%p3616_p10), %s2930_s8, 1024  }
 0xd4f   : > { %3887 = vsyncadd (%p3616_p10), %s2930_s8, 4294966272  ;;  %s4851_s14 = sld [smem:[#allocation28_spill]] }
 0xd55   : > { %p4852_p1 = scmp.ne.s32.totalorder %s4851_s14, 0 }
 0xd57   : > { %p3618_p12 = pnand %p3623_p11, %p4852_p1 }
 0xd59   : > { %p3619_p13 = pneg %p3618_p12 }
 0xd5b   : > { %3889 = dma.done.wait (%p3619_p13), %s2930_s8, 512  }
 0xd5c   : > { %3891 = vsyncadd (%p3619_p13), %s2930_s8, 4294966784  ;;  %s37_s18 = sadd.s32 1, %s4847_s13   ;;  %s4853_s26 = sld [smem:[#allocation16_spill]] }
 0xd5d   : > { %p34_p7 = scmp.ge.s32.totalorder %s37_s18, 4   ;;  %s4854_s27 = sld [smem:[#allocation17_spill]] }
 0xd5e   : > { %s4855_s28 = sld [smem:[#allocation29_spill]] }
 0xd5f   : > { %s4856_s29 = sld [smem:[#allocation18_spill]]  ;;  %36 = sbr.rel (!%p34_p7) target bundleno = 41 (0x29), region = 197 }
 0xd60   : > { %s4857_s30 = sld [smem:[#allocation19_spill]] }
 0xd61   : > { %s4858_s0 = sld [smem:[#allocation27_spill]] }
 0xd62   : > { %s4859_s17 = sld [smem:[#allocation20_spill]] }
 0xd63   : > { %s4860_s1 = sld [smem:[#allocation22_spill]] }
 0xd64   :  { %2944 = vsyncpa [#allocation6], 1 }
 0xd65   :  { %2946 = vsyncpa [#allocation6 + $0x1], 1 }
 0xd66   :  { %2947 = vsyncpa [#allocation8], 1 }
 0xd67   :  { %2949 = vsyncpa [#allocation8 + $0x1], 1 }

</bundles_post_ra>
